<compile_context>
chip_gen: v6e
topology: v6e:2x2x1
jax: 0.10.0
libtpu: 0.0.40
codegen_flags: <defaults>
</compile_context>

<pallas_src>
import functools

import jax
import jax.numpy as jnp
from jax import lax
from jax.experimental import pallas as pl
from jax.experimental.pallas import tpu as pltpu


# ----------------------------- config ------------------------------------- #
class Config:
    conf_thresh = 0.6
    iou_thresh = 0.5
    max_per_img = 16
    min_per_img = 1  # kept for parity; the torch wrapper's forward never uses it


NUM_CLASSES = 1            # wrapper calls postprocess(pred, 1, ...)
STEM_C = 32                # feature channels of the synthetic backbone
HEAD_C = 5 + NUM_CLASSES   # (cx, cy, w, h, obj, cls)
HEAD_PAD = 8               # head channels padded to 8 for alignment
STRIDE = 2                 # single detection level at stride 2
PACK = 16                  # anchors packed per lane-dense output row
NMS_TOPK = 128             # max candidates entering the fused IoU/NMS kernel

assert HEAD_C <= HEAD_PAD


def _compiler_params(**kw):
    """pltpu.CompilerParams with graceful fallback for older pltpu versions."""
    cls = getattr(pltpu, "CompilerParams", None)
    if cls is None:
        return None
    try:
        return cls(**kw)
    except TypeError:
        kw.pop("vmem_limit_bytes", None)
        try:
            return cls(**kw)
        except TypeError:
            return None


def _vmem_budget_bytes():
    """Per-generation VMEM budget: half of physical, capped at 64 MiB."""
    try:
        cap = int(pltpu.get_tpu_info().vmem_capacity_bytes)
    except Exception:
        cap = 128 * 1024 * 1024
    return max(16 * 1024 * 1024, min(cap // 2, 64 * 1024 * 1024))


# --------------------- fused stem + head + decode kernel ------------------- #
def _fused_stem_head_decode_kernel(x_ref, ws_ref, bs_ref, wh_ref, bh_ref,
                                   feat_ref, dec_ref,
                                   *, wo, band_h, pack, stride):
    """One aligned bf16 matmul for the 3x3/s2 conv (taps pre-concatenated
    host-side, anchors packed `pack`-per-row via block-diagonal weights),
    SiLU, 1x1 head, and YOLOX decode with lane-id masks.  Both outputs are
    lane-dense (trailing dims 512 and 128)."""
    # ---- stem conv: single MXU matmul, f32 accumulation ----
    acc = jnp.dot(x_ref[...], ws_ref[...], preferred_element_type=jnp.float32)
    acc = acc + bs_ref[...]
    feats = acc * jax.nn.sigmoid(acc)                 # SiLU in f32 (VPU + EUP)
    feat_ref[...] = feats.astype(feat_ref.dtype)      # lane-dense (rows, pack*32)

    # ---- 1x1 head on VMEM-resident features (block-diagonal, lane-dense) ----
    raw = jnp.dot(feats.astype(wh_ref.dtype), wh_ref[...],
                  preferred_element_type=jnp.float32) + bh_ref[...]

    # ---- YOLOX decode with iota lane masks (no narrow slices / concat) ----
    shape = raw.shape                                  # (rows, pack*8)
    row_i = lax.broadcasted_iota(jnp.int32, shape, 0)
    lane = lax.broadcasted_iota(jnp.int32, shape, 1)
    chan = lane & 7                                    # head channel 0..7
    a = (row_i * pack + (lane >> 3)).astype(jnp.float32)   # anchor index in band
    band = pl.program_id(1).astype(jnp.float32)
    ay = jnp.floor(a / float(wo))
    gx = a - ay * float(wo)
    gy = ay + band * float(band_h)

    is_x = chan == 0
    is_y = chan == 1
    is_wh = (chan == 2) | (chan == 3)
    is_sc = (chan == 4) | (chan == 5)

    grid_add = jnp.where(is_x, gx, 0.0) + jnp.where(is_y, gy, 0.0)
    val_xy = (raw + grid_add) * stride
    # clamp wh logits before exp for robustness with untrained weights
    val_wh = jnp.exp(jnp.minimum(raw, 20.0)) * stride
    val_sc = jax.nn.sigmoid(raw)
    dec = jnp.where(is_x | is_y, val_xy,
                    jnp.where(is_wh, val_wh,
                              jnp.where(is_sc, val_sc, 0.0)))
    dec_ref[...] = dec.astype(dec_ref.dtype)


def fused_stem_head_decode(xb, w_stem, b_stem, w_head, b_head,
                           *, band_h, wo, stride, vmem_limit):
    B, n_band, rows, kdim = xb.shape
    fdim = w_stem.shape[1]                              # PACK * STEM_C
    ddim = w_head.shape[1]                              # PACK * HEAD_PAD
    kern = functools.partial(
        _fused_stem_head_decode_kernel,
        wo=wo, band_h=band_h, pack=PACK, stride=float(stride))
    return pl.pallas_call(
        kern,
        out_shape=(
            jax.ShapeDtypeStruct((B, n_band, rows, fdim), jnp.float32),
            jax.ShapeDtypeStruct((B, n_band, rows, ddim), jnp.float32),
        ),
        grid=(B, n_band),
        in_specs=[
            pl.BlockSpec((None, None, rows, kdim), lambda b, r: (b, r, 0, 0)),
            pl.BlockSpec(w_stem.shape, lambda b, r: (0, 0)),
            pl.BlockSpec(b_stem.shape, lambda b, r: (0, 0)),
            pl.BlockSpec(w_head.shape, lambda b, r: (0, 0)),
            pl.BlockSpec(b_head.shape, lambda b, r: (0, 0)),
        ],
        out_specs=(
            pl.BlockSpec((None, None, rows, fdim), lambda b, r: (b, r, 0, 0)),
            pl.BlockSpec((None, None, rows, ddim), lambda b, r: (b, r, 0, 0)),
        ),
        compiler_params=_compiler_params(
            dimension_semantics=("parallel", "parallel"),
            vmem_limit_bytes=vmem_limit,
        ),
    )(xb, w_stem, b_stem, w_head, b_head)


# ----------------------- host-side layout plumbing ------------------------- #
def _pick_band_height(ho, wo, c16, slab_budget_bytes, batch):
    """Largest divisor of `ho` whose per-band working set fits the budget;
    with batch==1 keep >= 2 bands so both v7x TensorCores get work."""
    per_row = wo * (c16 * 2 * 2          # bf16 slab, double-buffered
                    + STEM_C * 4 * 2     # f32 features out, double-buffered
                    + HEAD_PAD * 4 * 2)  # f32 decode out, double-buffered
    cap = max(1, slab_budget_bytes // max(per_row, 1))
    divisors = [d for d in range(1, ho + 1) if ho % d == 0]
    fits = [d for d in divisors if d <= cap] or [1]
    band_h = max(fits)
    if batch == 1 and band_h == ho and ho > 1:
        halves = [d for d in fits if d <= ho // 2]
        if halves:
            band_h = max(halves)
    return band_h


def _build_packed_slab(x_nhwc, band_h, a_pad):
    """Pad + 2x2 space-to-depth, concat the 4 conv taps along channels (16C
    per output pixel), cast to bf16 once, split into row-bands and pack
    PACK anchors per slab row (lane-dense input for the block-diag matmul)."""
    B, H, W, C = x_nhwc.shape
    ho, wo = H // 2, W // 2
    n_band = ho // band_h
    xp = jnp.pad(x_nhwc, ((0, 0), (1, 1), (1, 1), (0, 0)))
    x4 = xp.reshape(B, ho + 1, 2, wo + 1, 2, C)
    x4 = x4.transpose(0, 1, 3, 2, 4, 5).reshape(B, ho + 1, wo + 1, 4 * C)
    taps = [x4[:, di:di + ho, dj:dj + wo, :] for di in (0, 1) for dj in (0, 1)]
    patches = jnp.concatenate(taps, axis=-1).astype(jnp.bfloat16)  # (B,ho,wo,16C)
    a = band_h * wo
    slab = patches.reshape(B, n_band, a, 16 * C)
    slab = jnp.pad(slab, ((0, 0), (0, 0), (0, a_pad - a), (0, 0)))
    return slab.reshape(B, n_band, a_pad // PACK, PACK * 16 * C)


def _build_flat_conv_weight(w_conv):
    """Reorganize (3,3,C,OC) conv weights into a single zero-masked (16C, OC)
    matrix matching the tap-concatenated slab layout (tap-major, phase, c)."""
    C, OC = w_conv.shape[2], w_conv.shape[3]
    blocks = []
    for di in (0, 1):
        for dj in (0, 1):
            for p in (0, 1):
                for q in (0, 1):
                    ki, kj = 2 * di + p, 2 * dj + q
                    if ki < 3 and kj < 3:
                        blocks.append(w_conv[ki, kj])
                    else:
                        blocks.append(jnp.zeros((C, OC), w_conv.dtype))
    return jnp.concatenate(blocks, axis=0)              # (16C, OC)


# ---------------------------- model (glue) --------------------------------- #
def init_params(key, in_ch=3):
    k1, k2, k3, k4 = jax.random.split(key, 4)
    return {
        "w_conv": jax.random.normal(k1, (3, 3, in_ch, STEM_C), jnp.float32) * 0.02,
        "b_stem": jax.random.normal(k2, (STEM_C,), jnp.float32) * 0.02,
        "w_head": jax.random.normal(k3, (STEM_C, HEAD_C), jnp.float32) * 0.02,
        "b_head": jax.random.normal(k4, (HEAD_C,), jnp.float32) * 0.02,
    }


def yolox_model(params, x_nhwc):
    """Tiny synthetic YOLOX: 3x3/s2 SiLU stem + 1x1 head + decode, run as one
    fused Pallas kernel per (image, row-band) with lane-dense outputs."""
    B, H, W, C = x_nhwc.shape
    assert H % 2 == 0 and W % 2 == 0
    ho, wo = H // STRIDE, W // STRIDE

    budget = _vmem_budget_bytes()
    band_h = _pick_band_height(ho, wo, 16 * C, budget // 2, batch=B)
    n_band = ho // band_h
    a_band = band_h * wo
    a_pad = ((a_band + PACK - 1) // PACK) * PACK

    xb = _build_packed_slab(x_nhwc, band_h, a_pad)       # (B,n_band,rows,PACK*16C) bf16

    eye = jnp.eye(PACK, dtype=jnp.float32)
    w_flat = _build_flat_conv_weight(params["w_conv"])    # (16C, 32)
    w_stem = jnp.kron(eye, w_flat).astype(jnp.bfloat16)   # block-diag (PACK*16C, PACK*32)
    b_stem = jnp.tile(params["b_stem"], PACK).reshape(1, PACK * STEM_C)
    w_head_p = jnp.pad(params["w_head"], ((0, 0), (0, HEAD_PAD - HEAD_C)))
    w_head = jnp.kron(eye, w_head_p).astype(jnp.bfloat16)  # (PACK*32, PACK*8)
    b_head = jnp.tile(jnp.pad(params["b_head"], (0, HEAD_PAD - HEAD_C)),
                      PACK).reshape(1, PACK * HEAD_PAD)

    feat4, dec4 = fused_stem_head_decode(
        xb, w_stem, b_stem, w_head, b_head,
        band_h=band_h, wo=wo, stride=STRIDE, vmem_limit=budget)

    # Unpack lane-dense slabs (cheap reshapes), drop per-band anchor padding.
    feats = feat4.reshape(B, n_band, a_pad, STEM_C)[:, :, :a_band, :]
    feats = feats.reshape(B, ho, wo, STEM_C)
    dec = dec4.reshape(B, n_band, a_pad, HEAD_PAD)[:, :, :a_band, :]
    dec = dec.reshape(B, ho * wo, HEAD_PAD)
    return dec, feats


# ----------------- fused pairwise-IoU + greedy-NMS kernel ------------------ #
def _iou_nms_kernel(bc_ref, br_ref, keep_ref, iou_scr, *, iou_thresh):
    """bc is [K, 8] (xyxy + pad), br is [8, K] (lane-dense; row 4 = valid).
    Computes the KxK IoU matrix into VMEM scratch and runs the greedy
    suppression loop in-kernel, emitting only the [1, K] keep mask."""
    bc = bc_ref[...]
    br = br_ref[...]
    x1c, y1c, x2c, y2c = bc[:, 0:1], bc[:, 1:2], bc[:, 2:3], bc[:, 3:4]
    x1r, y1r, x2r, y2r = br[0:1, :], br[1:2, :], br[2:3, :], br[3:4, :]
    area_c = (x2c - x1c) * (y2c - y1c)
    area_r = (x2r - x1r) * (y2r - y1r)
    iw = jnp.maximum(jnp.minimum(x2c, x2r) - jnp.maximum(x1c, x1r), 0.0)
    ih = jnp.maximum(jnp.minimum(y2c, y2r) - jnp.maximum(y1c, y1r), 0.0)
    inter = iw * ih
    iou_scr[...] = inter / (area_c + area_r - inter + 1e-9)

    K = bc.shape[0]
    col = lax.broadcasted_iota(jnp.int32, (1, K), 1)
    keep_ref[...] = br[4:5, :]                    # init keep = valid flags

    def nms_step(i, _):
        keep = keep_ref[...]
        cur = jnp.max(jnp.where(col == i, keep, 0.0))     # keep[i] via lane mask
        row = iou_scr[pl.ds(i, 1), :]                      # IoU row i, (1, K)
        sup = (row > iou_thresh) & (col > i)
        keep_ref[...] = jnp.where((cur > 0.0) & sup, 0.0, keep)
        return 0

    lax.fori_loop(0, K, nms_step, 0)


def iou_nms_keep(b_cols, b_rows, iou_thresh):
    K_pad = b_cols.shape[0]
    return pl.pallas_call(
        functools.partial(_iou_nms_kernel, iou_thresh=float(iou_thresh)),
        out_shape=jax.ShapeDtypeStruct((1, K_pad), jnp.float32),
        grid=(1,),
        in_specs=[
            pl.BlockSpec((K_pad, 8), lambda i: (0, 0)),
            pl.BlockSpec((8, K_pad), lambda i: (0, 0)),
        ],
        out_specs=pl.BlockSpec((1, K_pad), lambda i: (0, 0)),
        scratch_shapes=[pltpu.VMEM((K_pad, K_pad), jnp.float32)],
    )(b_cols, b_rows)


# ----------------------- postprocess (image 0) ----------------------------- #
def postprocess_single(pred, conf_thresh0, iou_thresh, max_det):
    """YOLOX postprocess for a single image with num_classes == 1.

    Returns fixed-size padded detections [max_det, 7]
    (x1, y1, x2, y2, obj_conf, class_conf, class_pred) and the valid count.
    """
    A = pred.shape[0]
    cx, cy, w, h = pred[:, 0], pred[:, 1], pred[:, 2], pred[:, 3]
    x1 = cx - w / 2.0
    y1 = cy - h / 2.0
    x2 = cx + w / 2.0
    y2 = cy + h / 2.0
    boxes = jnp.stack([x1, y1, x2, y2], axis=1)
    obj = pred[:, 4]
    class_conf = pred[:, 5]                     # max over the single class
    class_pred = jnp.zeros((A,), jnp.float32)   # argmax over 1 class == 0
    scores = obj * class_conf

    # Emulate the wrapper's `while pred_boxes_ is None:` threshold-lowering loop.
    def cond(state):
        t, it = state
        return jnp.logical_and(jnp.sum(scores >= t) == 0, it < 60)

    def body(state):
        t, it = state
        return jnp.maximum(t - 0.1, t / 10.0), it + 1

    t_final, _ = lax.while_loop(
        cond, body, (jnp.asarray(conf_thresh0, jnp.float32), jnp.asarray(0, jnp.int32)))
    valid = scores >= t_final

    # class_agnostic=False -> batched NMS via per-class coordinate offsets.
    max_coord = jnp.max(jnp.where(valid[:, None], boxes, 0.0))
    nms_boxes = boxes + (class_pred * (max_coord + 1.0))[:, None]

    # Top-k by score before the fused IoU/NMS kernel (O(k^2) IoU, VMEM-sized).
    K = min(A, NMS_TOPK)
    K_pad = ((K + 7) // 8) * 8
    score_key = jnp.where(valid, scores, -1.0)
    _, topi = lax.top_k(score_key, K)            # sorted descending
    valid_k = valid[topi]
    boxes_k = jnp.where(valid_k[:, None], nms_boxes[topi], 0.0)
    det_k = jnp.stack([x1, y1, x2, y2, obj, class_conf, class_pred], axis=1)[topi]

    b_cols = jnp.zeros((K_pad, 8), jnp.float32).at[:K, 0:4].set(boxes_k)
    b_rows = (jnp.zeros((8, K_pad), jnp.float32)
              .at[0:4, :K].set(boxes_k.T)
              .at[4, :K].set(valid_k.astype(jnp.float32)))

    keep_row = iou_nms_keep(b_cols, b_rows, iou_thresh)   # fused IoU + greedy NMS
    keep = keep_row[0, :K] > 0.5

    # Compact kept detections (score-sorted) into a fixed-size slab.
    rank = jnp.cumsum(keep) - 1
    slot = jnp.where(keep & (rank < max_det), rank, max_det)
    out = jnp.zeros((max_det + 1, 7), jnp.float32).at[slot].set(det_k)[:max_det]
    n_valid = jnp.minimum(jnp.sum(keep), max_det)
    return out, n_valid


# ----------------------------- wrapper ------------------------------------- #
def yolox_wrapper_forward(params, x_nchw):
    """Equivalent of YoloXWrapper.forward.

    Returns ([det_img0, n_valid_img0], [features]) where det_img0 is a
    fixed-size padded detection slab (dynamic-length torch output emulated
    with padding + count).  Features are NHWC [B, H/2, W/2, 32].
    """
    x = jnp.transpose(x_nchw, (0, 2, 3, 1)) * 255.0      # NCHW -> NHWC, x * 255
    pred_boxes, features = yolox_model(params, x)
    det0, n_valid = postprocess_single(
        pred_boxes[0], Config.conf_thresh, Config.iou_thresh, Config.max_per_img)
    # TODO(synk): real YOLOX returns multi-level FPN features; synthetic stem
    # features are returned here instead.
    return ([det0, n_valid], [features])


# ------------------------------- main -------------------------------------- #
if __name__ == "__main__":
    key = jax.random.PRNGKey(0)
    kp, kx = jax.random.split(key)
    params = init_params(kp, in_ch=3)
    # Input images like torch: BS x C x H x W, values in [0, 1].
    x = jax.random.uniform(kx, (2, 3, 16, 16), dtype=jnp.float32)

    fwd = jax.jit(yolox_wrapper_forward)
    (det0, n_valid), (features,) = fwd(params, x)
    jax.block_until_ready((det0, n_valid, features))

    assert det0.shape == (Config.max_per_img, 7)
    assert features.shape == (2, 8, 8, STEM_C)
    print("KERNEL_OK")
</pallas_src>

<mosaic_0001>
module attributes {stable_mosaic.version = 11 : i64} {
  func.func @_fused_stem_head_decode_kernel(%arg0: i32, %arg1: i32, %arg2: memref<1x1x4x768xbf16, #tpu.memory_space<vmem>>, %arg3: memref<768x512xbf16, #tpu.memory_space<vmem>>, %arg4: memref<1x512xf32, #tpu.memory_space<vmem>>, %arg5: memref<512x128xbf16, #tpu.memory_space<vmem>>, %arg6: memref<1x128xf32, #tpu.memory_space<vmem>>, %arg7: memref<1x1x4x512xf32, #tpu.memory_space<vmem>>, %arg8: memref<1x1x4x128xf32, #tpu.memory_space<vmem>>) attributes {dimension_semantics = [#tpu.dimension_semantics<parallel>, #tpu.dimension_semantics<parallel>], iteration_bounds = array<i64: 2, 1>, scalar_prefetch = 0 : i64, scratch_operands = 0 : i64, tpu.core_type = #tpu.core_type<tc>, window_params = [{transform_indices = @transform_0, window_bounds = array<i64: 1, 1, 4, 768>}, {pipeline_mode = #tpu.pipeline_mode<synchronous>, transform_indices = @transform_1, window_bounds = array<i64: 768, 512>}, {pipeline_mode = #tpu.pipeline_mode<synchronous>, transform_indices = @transform_2, window_bounds = array<i64: 1, 512>}, {pipeline_mode = #tpu.pipeline_mode<synchronous>, transform_indices = @transform_3, window_bounds = array<i64: 512, 128>}, {pipeline_mode = #tpu.pipeline_mode<synchronous>, transform_indices = @transform_4, window_bounds = array<i64: 1, 128>}, {transform_indices = @transform_5, window_bounds = array<i64: 1, 1, 4, 512>}, {transform_indices = @transform_6, window_bounds = array<i64: 1, 1, 4, 128>}]} {
    %c0 = arith.constant 0 : index
    %c0_0 = arith.constant 0 : index
    %c0_1 = arith.constant 0 : index
    %c0_2 = arith.constant 0 : index
    %0 = vector.load %arg2[%c0, %c0_0, %c0_1, %c0_2] : memref<1x1x4x768xbf16, #tpu.memory_space<vmem>>, vector<1x1x4x768xbf16>
    %1 = vector.shape_cast %0 : vector<1x1x4x768xbf16> to vector<4x768xbf16>
    %c0_3 = arith.constant 0 : index
    %c0_4 = arith.constant 0 : index
    %2 = vector.load %arg3[%c0_3, %c0_4] : memref<768x512xbf16, #tpu.memory_space<vmem>>, vector<768x512xbf16>
    %cst = arith.constant dense<0.000000e+00> : vector<4x512xf32>
    %3 = tpu.matmul %1, %2, %cst {dimension_numbers = #tpu.dot_dimension_numbers<[1], [0], [0], [1], [0, 0, 1, 1], [], []>} : vector<4x768xbf16>, vector<768x512xbf16>, vector<4x512xf32> -> vector<4x512xf32>
    %c0_5 = arith.constant 0 : index
    %c0_6 = arith.constant 0 : index
    %4 = vector.load %arg4[%c0_5, %c0_6] : memref<1x512xf32, #tpu.memory_space<vmem>>, vector<1x512xf32>
    %5 = vector.broadcast %4 : vector<1x512xf32> to vector<4x512xf32>
    %6 = arith.addf %3, %5 : vector<4x512xf32>
    %7 = arith.negf %6 : vector<4x512xf32>
    %8 = math.exp %7 : vector<4x512xf32>
    %cst_7 = arith.constant 1.000000e+00 : f32
    %9 = vector.broadcast %cst_7 : f32 to vector<4x512xf32>
    %10 = arith.addf %9, %8 : vector<4x512xf32>
    %11 = arith.divf %9, %10 : vector<4x512xf32>
    %12 = arith.mulf %6, %11 : vector<4x512xf32>
    %c0_8 = arith.constant 0 : index
    %c0_9 = arith.constant 0 : index
    %c0_10 = arith.constant 0 : index
    %c0_11 = arith.constant 0 : index
    %13 = vector.load %arg7[%c0_8, %c0_9, %c0_10, %c0_11] : memref<1x1x4x512xf32, #tpu.memory_space<vmem>>, vector<1x1x4x512xf32>
    %14 = vector.shape_cast %13 : vector<1x1x4x512xf32> to vector<4x512xf32>
    %15 = vector.shape_cast %12 : vector<4x512xf32> to vector<1x1x4x512xf32>
    tpu.vector_store %arg7[%c0_8, %c0_9, %c0_10, %c0_11], %15 {strides = array<i32>} : memref<1x1x4x512xf32, #tpu.memory_space<vmem>>, vector<1x1x4x512xf32>,
    %16 = arith.truncf %12 : vector<4x512xf32> to vector<4x512xbf16>
    %c0_12 = arith.constant 0 : index
    %c0_13 = arith.constant 0 : index
    %17 = vector.load %arg5[%c0_12, %c0_13] : memref<512x128xbf16, #tpu.memory_space<vmem>>, vector<512x128xbf16>
    %cst_14 = arith.constant dense<0.000000e+00> : vector<4x128xf32>
    %18 = tpu.matmul %16, %17, %cst_14 {dimension_numbers = #tpu.dot_dimension_numbers<[1], [0], [0], [1], [0, 0, 1, 1], [], []>} : vector<4x512xbf16>, vector<512x128xbf16>, vector<4x128xf32> -> vector<4x128xf32>
    %c0_15 = arith.constant 0 : index
    %c0_16 = arith.constant 0 : index
    %19 = vector.load %arg6[%c0_15, %c0_16] : memref<1x128xf32, #tpu.memory_space<vmem>>, vector<1x128xf32>
    %20 = vector.broadcast %19 : vector<1x128xf32> to vector<4x128xf32>
    %21 = arith.addf %18, %20 : vector<4x128xf32>
    %22 = tpu.iota {dimensions = array<i32: 0>} : vector<4x128xi32>
    %23 = tpu.iota {dimensions = array<i32: 1>} : vector<4x128xi32>
    %c7_i32 = arith.constant 7 : i32
    %24 = vector.broadcast %c7_i32 : i32 to vector<4x128xi32>
    %25 = arith.andi %23, %24 : vector<4x128xi32>
    %c16_i32 = arith.constant 16 : i32
    %26 = vector.broadcast %c16_i32 : i32 to vector<4x128xi32>
    %27 = arith.muli %22, %26 : vector<4x128xi32>
    %c3_i32 = arith.constant 3 : i32
    %28 = vector.broadcast %c3_i32 : i32 to vector<4x128xi32>
    %29 = arith.shrsi %23, %28 : vector<4x128xi32>
    %30 = arith.addi %27, %29 : vector<4x128xi32>
    %31 = arith.sitofp %30 : vector<4x128xi32> to vector<4x128xf32>
    %32 = arith.sitofp %arg1 : i32 to f32
    %cst_17 = arith.constant 8.000000e+00 : f32
    %33 = vector.broadcast %cst_17 : f32 to vector<4x128xf32>
    %34 = arith.divf %31, %33 : vector<4x128xf32>
    %35 = math.floor %34 : vector<4x128xf32>
    %cst_18 = arith.constant 8.000000e+00 : f32
    %36 = vector.broadcast %cst_18 : f32 to vector<4x128xf32>
    %37 = arith.mulf %35, %36 : vector<4x128xf32>
    %38 = arith.subf %31, %37 : vector<4x128xf32>
    %cst_19 = arith.constant 8.000000e+00 : f32
    %39 = arith.mulf %32, %cst_19 : f32
    %40 = vector.broadcast %39 : f32 to vector<4x128xf32>
    %41 = arith.addf %35, %40 : vector<4x128xf32>
    %c0_i32 = arith.constant 0 : i32
    %42 = vector.broadcast %c0_i32 : i32 to vector<4x128xi32>
    %43 = arith.cmpi eq, %25, %42 : vector<4x128xi32>
    %c1_i32 = arith.constant 1 : i32
    %44 = vector.broadcast %c1_i32 : i32 to vector<4x128xi32>
    %45 = arith.cmpi eq, %25, %44 : vector<4x128xi32>
    %c2_i32 = arith.constant 2 : i32
    %46 = vector.broadcast %c2_i32 : i32 to vector<4x128xi32>
    %47 = arith.cmpi eq, %25, %46 : vector<4x128xi32>
    %c3_i32_20 = arith.constant 3 : i32
    %48 = vector.broadcast %c3_i32_20 : i32 to vector<4x128xi32>
    %49 = arith.cmpi eq, %25, %48 : vector<4x128xi32>
    %50 = arith.ori %47, %49 : vector<4x128xi1>
    %c4_i32 = arith.constant 4 : i32
    %51 = vector.broadcast %c4_i32 : i32 to vector<4x128xi32>
    %52 = arith.cmpi eq, %25, %51 : vector<4x128xi32>
    %c5_i32 = arith.constant 5 : i32
    %53 = vector.broadcast %c5_i32 : i32 to vector<4x128xi32>
    %54 = arith.cmpi eq, %25, %53 : vector<4x128xi32>
    %55 = arith.ori %52, %54 : vector<4x128xi1>
    %cst_21 = arith.constant 0.000000e+00 : f32
    %56 = vector.broadcast %cst_21 : f32 to vector<4x128xf32>
    %57 = arith.select %43, %38, %56 : vector<4x128xi1>, vector<4x128xf32>
    %cst_22 = arith.constant 0.000000e+00 : f32
    %58 = vector.broadcast %cst_22 : f32 to vector<4x128xf32>
    %59 = arith.select %45, %41, %58 : vector<4x128xi1>, vector<4x128xf32>
    %60 = arith.addf %57, %59 : vector<4x128xf32>
    %61 = arith.addf %21, %60 : vector<4x128xf32>
    %cst_23 = arith.constant 2.000000e+00 : f32
    %62 = vector.broadcast %cst_23 : f32 to vector<4x128xf32>
    %63 = arith.mulf %61, %62 : vector<4x128xf32>
    %cst_24 = arith.constant 2.000000e+01 : f32
    %64 = vector.broadcast %cst_24 : f32 to vector<4x128xf32>
    %65 = arith.minimumf %21, %64 : vector<4x128xf32>
    %66 = math.exp %65 : vector<4x128xf32>
    %cst_25 = arith.constant 2.000000e+00 : f32
    %67 = vector.broadcast %cst_25 : f32 to vector<4x128xf32>
    %68 = arith.mulf %66, %67 : vector<4x128xf32>
    %69 = arith.negf %21 : vector<4x128xf32>
    %70 = math.exp %69 : vector<4x128xf32>
    %cst_26 = arith.constant 1.000000e+00 : f32
    %71 = vector.broadcast %cst_26 : f32 to vector<4x128xf32>
    %72 = arith.addf %71, %70 : vector<4x128xf32>
    %73 = arith.divf %71, %72 : vector<4x128xf32>
    %74 = arith.ori %43, %45 : vector<4x128xi1>
    %cst_27 = arith.constant 0.000000e+00 : f32
    %75 = vector.broadcast %cst_27 : f32 to vector<4x128xf32>
    %76 = arith.select %55, %73, %75 : vector<4x128xi1>, vector<4x128xf32>
    %77 = arith.select %50, %68, %76 : vector<4x128xi1>, vector<4x128xf32>
    %78 = arith.select %74, %63, %77 : vector<4x128xi1>, vector<4x128xf32>
    %c0_28 = arith.constant 0 : index
    %c0_29 = arith.constant 0 : index
    %c0_30 = arith.constant 0 : index
    %c0_31 = arith.constant 0 : index
    %79 = vector.load %arg8[%c0_28, %c0_29, %c0_30, %c0_31] : memref<1x1x4x128xf32, #tpu.memory_space<vmem>>, vector<1x1x4x128xf32>
    %80 = vector.shape_cast %79 : vector<1x1x4x128xf32> to vector<4x128xf32>
    %81 = vector.shape_cast %78 : vector<4x128xf32> to vector<1x1x4x128xf32>
    tpu.vector_store %arg8[%c0_28, %c0_29, %c0_30, %c0_31], %81 {strides = array<i32>} : memref<1x1x4x128xf32, #tpu.memory_space<vmem>>, vector<1x1x4x128xf32>,
    return
  }
  func.func @transform_0(%arg0: i32, %arg1: i32) -> (i32, i32, i32, i32) {
    %c0_i32 = arith.constant 0 : i32
    %c0_i32_0 = arith.constant 0 : i32
    %c0_i32_1 = arith.constant 0 : i32
    return %arg0, %arg1, %c0_i32, %c0_i32_0 : i32, i32, i32, i32
  }
  func.func @transform_1(%arg0: i32, %arg1: i32) -> (i32, i32) {
    %c0_i32 = arith.constant 0 : i32
    %c0_i32_0 = arith.constant 0 : i32
    %c0_i32_1 = arith.constant 0 : i32
    return %c0_i32, %c0_i32_0 : i32, i32
  }
  func.func @transform_2(%arg0: i32, %arg1: i32) -> (i32, i32) {
    %c0_i32 = arith.constant 0 : i32
    %c0_i32_0 = arith.constant 0 : i32
    %c0_i32_1 = arith.constant 0 : i32
    return %c0_i32, %c0_i32_0 : i32, i32
  }
  func.func @transform_3(%arg0: i32, %arg1: i32) -> (i32, i32) {
    %c0_i32 = arith.constant 0 : i32
    %c0_i32_0 = arith.constant 0 : i32
    %c0_i32_1 = arith.constant 0 : i32
    return %c0_i32, %c0_i32_0 : i32, i32
  }
  func.func @transform_4(%arg0: i32, %arg1: i32) -> (i32, i32) {
    %c0_i32 = arith.constant 0 : i32
    %c0_i32_0 = arith.constant 0 : i32
    %c0_i32_1 = arith.constant 0 : i32
    return %c0_i32, %c0_i32_0 : i32, i32
  }
  func.func @transform_5(%arg0: i32, %arg1: i32) -> (i32, i32, i32, i32) {
    %c0_i32 = arith.constant 0 : i32
    %c0_i32_0 = arith.constant 0 : i32
    %c0_i32_1 = arith.constant 0 : i32
    return %arg0, %arg1, %c0_i32, %c0_i32_0 : i32, i32, i32, i32
  }
  func.func @transform_6(%arg0: i32, %arg1: i32) -> (i32, i32, i32, i32) {
    %c0_i32 = arith.constant 0 : i32
    %c0_i32_0 = arith.constant 0 : i32
    %c0_i32_1 = arith.constant 0 : i32
    return %arg0, %arg1, %c0_i32, %c0_i32_0 : i32, i32, i32, i32
  }
}

module attributes {stable_mosaic.version = 11 : i64} {
  func.func @_iou_nms_kernel(%arg0: i32, %arg1: memref<64x8xf32, #tpu.memory_space<vmem>>, %arg2: memref<8x64xf32, #tpu.memory_space<vmem>>, %arg3: memref<1x64xf32, #tpu.memory_space<vmem>>, %arg4: memref<64x64xf32, #tpu.memory_space<vmem>>) attributes {dimension_semantics = [#tpu.dimension_semantics<arbitrary>], iteration_bounds = array<i64: 1>, scalar_prefetch = 0 : i64, scratch_operands = 1 : i64, tpu.core_type = #tpu.core_type<tc>, window_params = [{pipeline_mode = #tpu.pipeline_mode<synchronous>, transform_indices = @transform_0, window_bounds = array<i64: 64, 8>}, {pipeline_mode = #tpu.pipeline_mode<synchronous>, transform_indices = @transform_1, window_bounds = array<i64: 8, 64>}, {pipeline_mode = #tpu.pipeline_mode<synchronous>, transform_indices = @transform_2, window_bounds = array<i64: 1, 64>}]} {
    %c0 = arith.constant 0 : index
    %c0_0 = arith.constant 0 : index
    %0 = vector.load %arg1[%c0, %c0_0] : memref<64x8xf32, #tpu.memory_space<vmem>>, vector<64x8xf32>
    %c0_1 = arith.constant 0 : index
    %c0_2 = arith.constant 0 : index
    %1 = vector.load %arg2[%c0_1, %c0_2] : memref<8x64xf32, #tpu.memory_space<vmem>>, vector<8x64xf32>
    %2 = vector.extract_strided_slice %0 {offsets = [0, 0], sizes = [64, 1], strides = [1, 1]} : vector<64x8xf32> to vector<64x1xf32>
    %3 = vector.extract_strided_slice %0 {offsets = [0, 1], sizes = [64, 1], strides = [1, 1]} : vector<64x8xf32> to vector<64x1xf32>
    %4 = vector.extract_strided_slice %0 {offsets = [0, 2], sizes = [64, 1], strides = [1, 1]} : vector<64x8xf32> to vector<64x1xf32>
    %5 = vector.extract_strided_slice %0 {offsets = [0, 3], sizes = [64, 1], strides = [1, 1]} : vector<64x8xf32> to vector<64x1xf32>
    %6 = vector.extract_strided_slice %1 {offsets = [0, 0], sizes = [1, 64], strides = [1, 1]} : vector<8x64xf32> to vector<1x64xf32>
    %7 = vector.extract_strided_slice %1 {offsets = [1, 0], sizes = [1, 64], strides = [1, 1]} : vector<8x64xf32> to vector<1x64xf32>
    %8 = vector.extract_strided_slice %1 {offsets = [2, 0], sizes = [1, 64], strides = [1, 1]} : vector<8x64xf32> to vector<1x64xf32>
    %9 = vector.extract_strided_slice %1 {offsets = [3, 0], sizes = [1, 64], strides = [1, 1]} : vector<8x64xf32> to vector<1x64xf32>
    %10 = arith.subf %4, %2 : vector<64x1xf32>
    %11 = arith.subf %5, %3 : vector<64x1xf32>
    %12 = arith.mulf %10, %11 : vector<64x1xf32>
    %13 = arith.subf %8, %6 : vector<1x64xf32>
    %14 = arith.subf %9, %7 : vector<1x64xf32>
    %15 = arith.mulf %13, %14 : vector<1x64xf32>
    %16 = vector.broadcast %4 : vector<64x1xf32> to vector<64x64xf32>
    %17 = vector.broadcast %8 : vector<1x64xf32> to vector<64x64xf32>
    %18 = arith.minimumf %16, %17 : vector<64x64xf32>
    %19 = vector.broadcast %2 : vector<64x1xf32> to vector<64x64xf32>
    %20 = vector.broadcast %6 : vector<1x64xf32> to vector<64x64xf32>
    %21 = arith.maximumf %19, %20 : vector<64x64xf32>
    %22 = arith.subf %18, %21 : vector<64x64xf32>
    %cst = arith.constant 0.000000e+00 : f32
    %23 = vector.broadcast %cst : f32 to vector<64x64xf32>
    %24 = arith.maximumf %22, %23 : vector<64x64xf32>
    %25 = vector.broadcast %5 : vector<64x1xf32> to vector<64x64xf32>
    %26 = vector.broadcast %9 : vector<1x64xf32> to vector<64x64xf32>
    %27 = arith.minimumf %25, %26 : vector<64x64xf32>
    %28 = vector.broadcast %3 : vector<64x1xf32> to vector<64x64xf32>
    %29 = vector.broadcast %7 : vector<1x64xf32> to vector<64x64xf32>
    %30 = arith.maximumf %28, %29 : vector<64x64xf32>
    %31 = arith.subf %27, %30 : vector<64x64xf32>
    %cst_3 = arith.constant 0.000000e+00 : f32
    %32 = vector.broadcast %cst_3 : f32 to vector<64x64xf32>
    %33 = arith.maximumf %31, %32 : vector<64x64xf32>
    %34 = arith.mulf %24, %33 : vector<64x64xf32>
    %35 = vector.broadcast %12 : vector<64x1xf32> to vector<64x64xf32>
    %36 = vector.broadcast %15 : vector<1x64xf32> to vector<64x64xf32>
    %37 = arith.addf %35, %36 : vector<64x64xf32>
    %38 = arith.subf %37, %34 : vector<64x64xf32>
    %cst_4 = arith.constant 9.99999971E-10 : f32
    %39 = vector.broadcast %cst_4 : f32 to vector<64x64xf32>
    %40 = arith.addf %38, %39 : vector<64x64xf32>
    %41 = arith.divf %34, %40 : vector<64x64xf32>
    %c0_5 = arith.constant 0 : index
    %c0_6 = arith.constant 0 : index
    %42 = vector.load %arg4[%c0_5, %c0_6] : memref<64x64xf32, #tpu.memory_space<vmem>>, vector<64x64xf32>
    tpu.vector_store %arg4[%c0_5, %c0_6], %41 {strides = array<i32>} : memref<64x64xf32, #tpu.memory_space<vmem>>, vector<64x64xf32>,
    %43 = tpu.iota {dimensions = array<i32: 1>} : vector<1x64xi32>
    %44 = vector.extract_strided_slice %1 {offsets = [4, 0], sizes = [1, 64], strides = [1, 1]} : vector<8x64xf32> to vector<1x64xf32>
    %c0_7 = arith.constant 0 : index
    %c0_8 = arith.constant 0 : index
    %45 = vector.load %arg3[%c0_7, %c0_8] : memref<1x64xf32, #tpu.memory_space<vmem>>, vector<1x64xf32>
    tpu.vector_store %arg3[%c0_7, %c0_8], %44 {strides = array<i32>} : memref<1x64xf32, #tpu.memory_space<vmem>>, vector<1x64xf32>,
    %c0_i32 = arith.constant 0 : i32
    %c64_i32 = arith.constant 64 : i32
    %46 = arith.addi %c0_i32, %c64_i32 : i32
    %c1_i32 = arith.constant 1 : i32
    scf.for %arg5 = %c0_i32 to %46 step %c1_i32  : i32 {
      %c0_10 = arith.constant 0 : index
      %c0_11 = arith.constant 0 : index
      %47 = vector.load %arg3[%c0_10, %c0_11] : memref<1x64xf32, #tpu.memory_space<vmem>>, vector<1x64xf32>
      %48 = vector.broadcast %arg5 : i32 to vector<1x64xi32>
      %49 = arith.cmpi eq, %43, %48 : vector<1x64xi32>
      %cst_12 = arith.constant 0.000000e+00 : f32
      %50 = vector.broadcast %cst_12 : f32 to vector<1x64xf32>
      %51 = arith.select %49, %47, %50 : vector<1x64xi1>, vector<1x64xf32>
      %52 = vector.shape_cast %51 : vector<1x64xf32> to vector<1x1x64xf32>
      %cst_13 = arith.constant dense<0xFF800000> : vector<1xf32>
      %53 = vector.multi_reduction <maximumf>, %52, %cst_13 [1, 2] : vector<1x1x64xf32> to vector<1xf32>
      %54 = vector.shape_cast %53 : vector<1xf32> to vector<1x1x1xf32>
      %55 = vector.extract %54[0, 0, 0] : f32 from vector<1x1x1xf32>
      %56 = arith.index_cast %arg5 : i32 to index
      %c0_14 = arith.constant 0 : index
      %57 = vector.load %arg4[%56, %c0_14] : memref<64x64xf32, #tpu.memory_space<vmem>>, vector<1x64xf32>
      %cst_15 = arith.constant 5.000000e-01 : f32
      %58 = vector.broadcast %cst_15 : f32 to vector<1x64xf32>
      %59 = arith.cmpf ogt, %57, %58 : vector<1x64xf32>
      %60 = vector.broadcast %arg5 : i32 to vector<1x64xi32>
      %61 = arith.cmpi sgt, %43, %60 : vector<1x64xi32>
      %62 = arith.andi %59, %61 : vector<1x64xi1>
      %cst_16 = arith.constant 0.000000e+00 : f32
      %63 = arith.cmpf ogt, %55, %cst_16 : f32
      %64 = vector.broadcast %63 : i1 to vector<1x64xi1>
      %65 = arith.andi %64, %62 : vector<1x64xi1>
      %cst_17 = arith.constant 0.000000e+00 : f32
      %66 = vector.broadcast %cst_17 : f32 to vector<1x64xf32>
      %67 = arith.select %65, %66, %47 : vector<1x64xi1>, vector<1x64xf32>
      %c0_18 = arith.constant 0 : index
      %c0_19 = arith.constant 0 : index
      %68 = vector.load %arg3[%c0_18, %c0_19] : memref<1x64xf32, #tpu.memory_space<vmem>>, vector<1x64xf32>
      tpu.vector_store %arg3[%c0_18, %c0_19], %67 {strides = array<i32>} : memref<1x64xf32, #tpu.memory_space<vmem>>, vector<1x64xf32>,
    }
    %c64_i32_9 = arith.constant 64 : i32
    return
  }
  func.func @transform_0(%arg0: i32) -> (i32, i32) {
    %c0_i32 = arith.constant 0 : i32
    %c0_i32_0 = arith.constant 0 : i32
    %c0_i32_1 = arith.constant 0 : i32
    return %c0_i32, %c0_i32_0 : i32, i32
  }
  func.func @transform_1(%arg0: i32) -> (i32, i32) {
    %c0_i32 = arith.constant 0 : i32
    %c0_i32_0 = arith.constant 0 : i32
    %c0_i32_1 = arith.constant 0 : i32
    return %c0_i32, %c0_i32_0 : i32, i32
  }
  func.func @transform_2(%arg0: i32) -> (i32, i32) {
    %c0_i32 = arith.constant 0 : i32
    %c0_i32_0 = arith.constant 0 : i32
    %c0_i32_1 = arith.constant 0 : i32
    return %c0_i32, %c0_i32_0 : i32, i32
  }
}

</mosaic_0001>

<bundles_post_ra>
// kernel: tile.13
= control target key start
LH: loop header
LB: loop body
LE: loop exit
PB: predicated region body
PF: predicated region fallthrough
CT: control target
= control target key end

     0   :  { %s28_s0 = inlined_call_operand.vmem [shape: f32[32], index: 0, kind: input, shape index: {}]   ;;  %s29_s1 = inlined_call_operand.vmem [shape: f32[16,32], index: 1, kind: output, shape index: {}]  }
   0x1   :  { %v4_v0 = vld [vmem:[%s28_s0] ss:$0 sm:$0xff] }
   0x2   :  { %5 = vst [vmem:[%s29_s1] sm:$0xff] %v4_v0  ;;  %8 = vst [vmem:[%s29_s1 + $0x8] sm:$0xff] %v4_v0 }

// kernel: tile.14
= control target key start
LH: loop header
LB: loop body
LE: loop exit
PB: predicated region body
PF: predicated region fallthrough
CT: control target
= control target key end

     0   :  { %s62_s8 = smov 96   ;;  %vm3_vm0 = vcmask 261120   ;;  %s64_s15 = smov 64   ;;  %vm9_vm1 = vcmask 1048320   ;;  %vm15_vm2 = vcmask 785920   ;;  %vm21_vm3 = vcmask 523520   ;;  %s99_s0 = inlined_call_operand.vmem [shape: f32[16,32], index: 0, kind: input, shape index: {}]   ;;  %s100_s1 = inlined_call_operand.vmem [shape: f32[1,512], index: 1, kind: output, shape index: {}]  }
   0x1   :  { %v53_v0 = vld [vmem:[%s99_s0 + $0x3] ss:$4 sm:$0xf]   ;;  %v54_v1 = vld [vmem:[%s99_s0 + $0x2] ss:$4 sm:$0xf]  }
   0x2   :  { %7 = vrot.lane.b32.xlu0 %v53_v0, %s62_s8  ;;  %v55_v2 = vld [vmem:[%s99_s0 + $0x1] ss:$4 sm:$0xf]   ;;  %v2_v3 = vld [vmem:[%s99_s0] ss:$4 sm:$0xf]  }
   0x3   :  { %s63_s0 = smov 32   ;;  %4 = vst.msk [vmem:[#allocation0] ss:$8 sm:$0xf] %vm3_vm0, %v2_v3  }
   0x4   :  { %19 = vrot.lane.b32.xlu1 %v55_v2, %s63_s0 }
   0x6   :  { %13 = vrot.lane.b32.xlu0 %v54_v1, %s64_s15 }
  0x74   :  { %v8_v4 = vpop.permute.xlu0 %7  }
  0x75   :  { %10 = vst.msk [vmem:[#allocation0] ss:$8 sm:$0xf] %vm9_vm1, %v8_v4  }
  0x76   :  { %v20_v5 = vpop.permute.xlu1 %19  }
  0x78   :  { %v14_v6 = vpop.permute.xlu0 %13  }
  0x79   :  { %16 = vst.msk [vmem:[#allocation0] ss:$8 sm:$0xf] %vm15_vm2, %v14_v6  }
  0x7a   :  { %22 = vst.msk [vmem:[#allocation0] ss:$8 sm:$0xf] %vm21_vm3, %v20_v5  }
  0x81   :  { %v27_v7 = vld [vmem:[#allocation0] sm:$0x1]  ;;  %v32_v8 = vld [vmem:[#allocation0 + $0x8] sm:$0x1]  ;;  %v38_v9 = vld [vmem:[#allocation0 + $0x10] sm:$0x1] }
  0x82   :  { %30 = vst [vmem:[%s100_s1] sm:$0x1] %v27_v7  ;;  %56 = vst [vmem:[%s100_s1 + $0x1] sm:$0x1] %v32_v8  ;;  %v45_v10 = vld [vmem:[#allocation0 + $0x18] sm:$0x1] }
  0x83   :  { %57 = vst [vmem:[%s100_s1 + $0x2] sm:$0x1] %v38_v9  ;;  %58 = vst [vmem:[%s100_s1 + $0x3] sm:$0x1] %v45_v10 }

// kernel: tile.18
= control target key start
LH: loop header
LB: loop body
LE: loop exit
PB: predicated region body
PF: predicated region fallthrough
CT: control target
= control target key end

     0   :  { %s28_s0 = inlined_call_operand.vmem [shape: f32[8], index: 0, kind: input, shape index: {}]   ;;  %s29_s1 = inlined_call_operand.vmem [shape: f32[16,8], index: 1, kind: output, shape index: {}]  }
   0x1   :  { %v4_v0 = vld [vmem:[%s28_s0] ss:$0 sm:$0xff] }
   0x2   :  { %5 = vst [vmem:[%s29_s1] sm:$0xff] %v4_v0  ;;  %8 = vst [vmem:[%s29_s1 + $0x8] sm:$0xff] %v4_v0 }

// kernel: tile.19
= control target key start
LH: loop header
LB: loop body
LE: loop exit
PB: predicated region body
PF: predicated region fallthrough
CT: control target
= control target key end

     0   :  { %s133_s10 = smov 120   ;;  %s134_s11 = smov 104   ;;  %vm3_vm0 = vcmask 64512   ;;  %vm9_vm1 = vcmask 1048512   ;;  %vm15_vm2 = vcmask 982912   ;;  %vm21_vm3 = vcmask 917312   ;;  %s209_s0 = inlined_call_operand.vmem [shape: f32[16,8], index: 0, kind: input, shape index: {}]   ;;  %s210_s1 = inlined_call_operand.vmem [shape: f32[1,128], index: 1, kind: output, shape index: {}]  }
   0x1   :  { %v103_v0 = vld [vmem:[%s209_s0 + $0xf] sm:$0x1]   ;;  %v105_v1 = vld [vmem:[%s209_s0 + $0xd] sm:$0x1]   ;;  %v104_v2 = vld [vmem:[%s209_s0 + $0xe] sm:$0x1]  }
   0x2   :  { %7 = vrot.lane.b32.xlu0 %v103_v0, %s133_s10  ;;  %19 = vrot.lane.b32.xlu1 %v105_v1, %s134_s11  ;;  %v106_v3 = vld [vmem:[%s209_s0 + $0xc] sm:$0x1]   ;;  %s135_s16 = smov 112   ;;  %s136_s17 = smov 96   ;;  %v107_v4 = vld [vmem:[%s209_s0 + $0xb] sm:$0x1]  }
   0x3   :  { %v108_v5 = vld [vmem:[%s209_s0 + $0xa] sm:$0x1]   ;;  %v2_v6 = vld [vmem:[%s209_s0] sm:$0x1]   ;;  %s137_s24 = smov 88   ;;  %s138_s25 = smov 80  }
   0x4   :  { %4 = vst.msk [vmem:[#allocation0] sm:$0x1] %vm3_vm0, %v2_v6   ;;  %v109_v7 = vld [vmem:[%s209_s0 + $0x9] sm:$0x1]   ;;  %v110_v8 = vld [vmem:[%s209_s0 + $0x8] sm:$0x1]  }
   0x5   :  { %s139_s30 = smov 72   ;;  %s140_s2 = smov 64   ;;  %v111_v9 = vld [vmem:[%s209_s0 + $0x7] sm:$0x1]   ;;  %v112_v10 = vld [vmem:[%s209_s0 + $0x6] sm:$0x1]  }
   0x6   :  { %13 = vrot.lane.b32.xlu0 %v104_v2, %s135_s16  ;;  %25 = vrot.lane.b32.xlu1 %v106_v3, %s136_s17  ;;  %s141_s7 = smov 56   ;;  %s142_s8 = smov 48   ;;  %v113_v11 = vld [vmem:[%s209_s0 + $0x5] sm:$0x1]   ;;  %v114_v12 = vld [vmem:[%s209_s0 + $0x4] sm:$0x1]  }
   0x7   :  { %s143_s13 = smov 40   ;;  %s144_s14 = smov 32   ;;  %v115_v13 = vld [vmem:[%s209_s0 + $0x3] sm:$0x1]   ;;  %v116_v14 = vld [vmem:[%s209_s0 + $0x2] sm:$0x1]  }
   0x8   :  { %s145_s19 = smov 24   ;;  %s146_s20 = smov 16   ;;  %v117_v15 = vld [vmem:[%s209_s0 + $0x1] sm:$0x1]   ;;  %vm27_vm4 = vcmask 851712   ;;  %vm33_vm5 = vcmask 786112  }
   0x9   :  { %s147_s0 = smov 8   ;;  %vm39_vm6 = vcmask 720512   ;;  %vm45_vm7 = vcmask 654912   ;;  %vm51_vm8 = vcmask 589312   ;;  %vm57_vm9 = vcmask 523712  }
   0xa   :  { %31 = vrot.lane.b32.xlu0 %v107_v4, %s137_s24  ;;  %37 = vrot.lane.b32.xlu1 %v108_v5, %s138_s25  ;;  %vm63_vm10 = vcmask 458112   ;;  %vm69_vm11 = vcmask 392512   ;;  %vm75_vm12 = vcmask 326912   ;;  %vm81_vm13 = vcmask 261312  }
   0xb   :  { %vm87_vm14 = vcmask 195712   ;;  %vm93_vm15 = vcmask 130112  }
   0xe   :  { %43 = vrot.lane.b32.xlu0 %v109_v7, %s139_s30  ;;  %49 = vrot.lane.b32.xlu1 %v110_v8, %s140_s2 }
  0x12   :  { %55 = vrot.lane.b32.xlu0 %v111_v9, %s141_s7  ;;  %61 = vrot.lane.b32.xlu1 %v112_v10, %s142_s8 }
  0x16   :  { %67 = vrot.lane.b32.xlu0 %v113_v11, %s143_s13  ;;  %73 = vrot.lane.b32.xlu1 %v114_v12, %s144_s14 }
  0x1a   :  { %79 = vrot.lane.b32.xlu0 %v115_v13, %s145_s19  ;;  %85 = vrot.lane.b32.xlu1 %v116_v14, %s146_s20 }
  0x1e   :  { %91 = vrot.lane.b32.xlu0 %v117_v15, %s147_s0 }
  0x74   :  { %v8_v16 = vpop.permute.xlu0 %7   ;;  %v20_v17 = vpop.permute.xlu1 %19  }
  0x75   :  { %10 = vst.msk [vmem:[#allocation0] sm:$0x1] %vm9_vm1, %v8_v16  }
  0x78   :  { %v14_v18 = vpop.permute.xlu0 %13   ;;  %v26_v19 = vpop.permute.xlu1 %25  }
  0x79   :  { %16 = vst.msk [vmem:[#allocation0] sm:$0x1] %vm15_vm2, %v14_v18  }
  0x7a   :  { %22 = vst.msk [vmem:[#allocation0] sm:$0x1] %vm21_vm3, %v20_v17  }
  0x7b   :  { %28 = vst.msk [vmem:[#allocation0] sm:$0x1] %vm27_vm4, %v26_v19  }
  0x7c   :  { %v32_v20 = vpop.permute.xlu0 %31   ;;  %v38_v21 = vpop.permute.xlu1 %37  }
  0x7d   :  { %34 = vst.msk [vmem:[#allocation0] sm:$0x1] %vm33_vm5, %v32_v20  }
  0x7e   :  { %40 = vst.msk [vmem:[#allocation0] sm:$0x1] %vm39_vm6, %v38_v21  }
  0x80   :  { %v44_v22 = vpop.permute.xlu0 %43   ;;  %v50_v23 = vpop.permute.xlu1 %49  }
  0x81   :  { %46 = vst.msk [vmem:[#allocation0] sm:$0x1] %vm45_vm7, %v44_v22  }
  0x82   :  { %52 = vst.msk [vmem:[#allocation0] sm:$0x1] %vm51_vm8, %v50_v23  }
  0x84   :  { %v56_v24 = vpop.permute.xlu0 %55   ;;  %v62_v25 = vpop.permute.xlu1 %61  }
  0x85   :  { %58 = vst.msk [vmem:[#allocation0] sm:$0x1] %vm57_vm9, %v56_v24  }
  0x86   :  { %64 = vst.msk [vmem:[#allocation0] sm:$0x1] %vm63_vm10, %v62_v25  }
  0x88   :  { %v68_v26 = vpop.permute.xlu0 %67   ;;  %v74_v27 = vpop.permute.xlu1 %73  }
  0x89   :  { %70 = vst.msk [vmem:[#allocation0] sm:$0x1] %vm69_vm11, %v68_v26  }
  0x8a   :  { %76 = vst.msk [vmem:[#allocation0] sm:$0x1] %vm75_vm12, %v74_v27  }
  0x8c   :  { %v80_v28 = vpop.permute.xlu0 %79   ;;  %v86_v29 = vpop.permute.xlu1 %85  }
  0x8d   :  { %82 = vst.msk [vmem:[#allocation0] sm:$0x1] %vm81_vm13, %v80_v28  }
  0x8e   :  { %88 = vst.msk [vmem:[#allocation0] sm:$0x1] %vm87_vm14, %v86_v29  }
  0x90   :  { %v92_v30 = vpop.permute.xlu0 %91  }
  0x91   :  { %94 = vst.msk [vmem:[#allocation0] sm:$0x1] %vm93_vm15, %v92_v30  }
  0x98   :  { %v99_v31 = vld [vmem:[#allocation0] sm:$0x1] }
  0x99   :  { %102 = vst [vmem:[%s210_s1] sm:$0x1] %v99_v31 }

// kernel: squeeze.26
= control target key start
LH: loop header
LB: loop body
LE: loop exit
PB: predicated region body
PF: predicated region fallthrough
CT: control target
= control target key end

     0   :  { %s177_s8 = smov 104   ;;  %s178_s9 = smov 112   ;;  %vm8_vm0 = vcmask 64512   ;;  %s332_s0 = inlined_call_operand.vmem [shape: f32[1,1,4,128], index: 0, kind: input, shape index: {}]   ;;  %s333_s1 = inlined_call_operand.vmem [shape: f32[64,8], index: 1, kind: output, shape index: {}]  }
   0x1   :  { %v5_v0 = vld [vmem:[%s332_s0] sm:$0xf]  ;;  %s176_s0 = smov 120   ;;  %s179_s10 = smov 96  }
   0x2   :  { %6 = vst [vmem:[#allocation0] sm:$0xf] %v5_v0  ;;  %s180_s11 = smov 88   ;;  %s181_s12 = smov 80  }
   0x3   :  { %s182_s13 = smov 72   ;;  %s183_s14 = smov 64  }
   0x4   :  { %s184_s19 = smov 56   ;;  %s185_s20 = smov 48  }
   0x5   :  { %s186_s21 = smov 40   ;;  %s187_s22 = smov 32  }
   0x6   :  { %s188_s23 = smov 24   ;;  %s189_s24 = smov 16  }
   0x7   :  { %s190_s25 = smov 8  }
   0x9   :  { %v11_v1 = vld [vmem:[#allocation0] sm:$0xf]  }
   0xa   :  { %v27_v2 = vld [vmem:[#allocation0] sm:$0xf]   ;;  %12 = vrot.lane.b32.xlu0 %v11_v1, %s176_s0 }
   0xb   :  { %28 = vrot.lane.b32.xlu1 %v27_v2, %s177_s8  ;;  %v19_v3 = vld [vmem:[#allocation0] sm:$0xf]  }
   0xc   :  { %v35_v4 = vld [vmem:[#allocation0] sm:$0xf]  }
   0xd   :  { %v43_v5 = vld [vmem:[#allocation0] sm:$0xf]  }
   0xe   :  { %20 = vrot.lane.b32.xlu0 %v19_v3, %s178_s9  ;;  %v51_v6 = vld [vmem:[#allocation0] sm:$0xf]  }
   0xf   :  { %36 = vrot.lane.b32.xlu1 %v35_v4, %s179_s10  ;;  %v59_v7 = vld [vmem:[#allocation0] sm:$0xf]  }
  0x10   :  { %v67_v8 = vld [vmem:[#allocation0] sm:$0xf]  }
  0x11   :  { %v75_v9 = vld [vmem:[#allocation0] sm:$0xf]  }
  0x12   :  { %44 = vrot.lane.b32.xlu0 %v43_v5, %s180_s11  ;;  %v83_v10 = vld [vmem:[#allocation0] sm:$0xf]  }
  0x13   :  { %52 = vrot.lane.b32.xlu1 %v51_v6, %s181_s12  ;;  %v7_v11 = vld [vmem:[#allocation0] sm:$0xf]  }
  0x14   :  { %9 = vst.msk [vmem:[%s333_s1] ss:$16 sm:$0x3] %vm8_vm0, %v7_v11   ;;  %10 = vst.msk [vmem:[%s333_s1] ss:$16 sm:$0xc] %vm8_vm0, %v7_v11  }
  0x15   :  { %v91_v12 = vld [vmem:[#allocation0] sm:$0xf]  }
  0x16   :  { %60 = vrot.lane.b32.xlu0 %v59_v7, %s182_s13  ;;  %v99_v13 = vld [vmem:[#allocation0] sm:$0xf]  }
  0x17   :  { %68 = vrot.lane.b32.xlu1 %v67_v8, %s183_s14  ;;  %v107_v14 = vld [vmem:[#allocation0] sm:$0xf]  }
  0x18   :  { %v115_v15 = vld [vmem:[#allocation0] sm:$0xf]  }
  0x19   :  { %v123_v16 = vld [vmem:[#allocation0] sm:$0xf]  }
  0x1a   :  { %76 = vrot.lane.b32.xlu0 %v75_v9, %s184_s19 }
  0x1b   :  { %84 = vrot.lane.b32.xlu1 %v83_v10, %s185_s20 }
  0x1e   :  { %92 = vrot.lane.b32.xlu0 %v91_v12, %s186_s21 }
  0x1f   :  { %100 = vrot.lane.b32.xlu1 %v99_v13, %s187_s22 }
  0x22   :  { %108 = vrot.lane.b32.xlu0 %v107_v14, %s188_s23 }
  0x23   :  { %116 = vrot.lane.b32.xlu1 %v115_v15, %s189_s24 }
  0x26   :  { %124 = vrot.lane.b32.xlu0 %v123_v16, %s190_s25 }
  0x7c   :  { %v13_v17 = vpop.permute.xlu0 %12  }
  0x7d   :  { %v29_v18 = vpop.permute.xlu1 %28   ;;  %131 = vst.msk [vmem:[%s333_s1 + $0x1] ss:$16 sm:$0x3] %vm8_vm0, %v13_v17   ;;  %132 = vst.msk [vmem:[%s333_s1 + $0x1] ss:$16 sm:$0xc] %vm8_vm0, %v13_v17  }
  0x7e   :  { %135 = vst.msk [vmem:[%s333_s1 + $0x3] ss:$16 sm:$0x3] %vm8_vm0, %v29_v18   ;;  %136 = vst.msk [vmem:[%s333_s1 + $0x3] ss:$16 sm:$0xc] %vm8_vm0, %v29_v18  }
  0x80   :  { %v21_v19 = vpop.permute.xlu0 %20  }
  0x81   :  { %v37_v20 = vpop.permute.xlu1 %36   ;;  %133 = vst.msk [vmem:[%s333_s1 + $0x2] ss:$16 sm:$0x3] %vm8_vm0, %v21_v19   ;;  %134 = vst.msk [vmem:[%s333_s1 + $0x2] ss:$16 sm:$0xc] %vm8_vm0, %v21_v19  }
  0x82   :  { %137 = vst.msk [vmem:[%s333_s1 + $0x4] ss:$16 sm:$0x3] %vm8_vm0, %v37_v20   ;;  %138 = vst.msk [vmem:[%s333_s1 + $0x4] ss:$16 sm:$0xc] %vm8_vm0, %v37_v20  }
  0x84   :  { %v45_v21 = vpop.permute.xlu0 %44  }
  0x85   :  { %v53_v22 = vpop.permute.xlu1 %52   ;;  %139 = vst.msk [vmem:[%s333_s1 + $0x5] ss:$16 sm:$0x3] %vm8_vm0, %v45_v21   ;;  %140 = vst.msk [vmem:[%s333_s1 + $0x5] ss:$16 sm:$0xc] %vm8_vm0, %v45_v21  }
  0x86   :  { %141 = vst.msk [vmem:[%s333_s1 + $0x6] ss:$16 sm:$0x3] %vm8_vm0, %v53_v22   ;;  %142 = vst.msk [vmem:[%s333_s1 + $0x6] ss:$16 sm:$0xc] %vm8_vm0, %v53_v22  }
  0x88   :  { %v61_v23 = vpop.permute.xlu0 %60  }
  0x89   :  { %v69_v24 = vpop.permute.xlu1 %68   ;;  %143 = vst.msk [vmem:[%s333_s1 + $0x7] ss:$16 sm:$0x3] %vm8_vm0, %v61_v23   ;;  %144 = vst.msk [vmem:[%s333_s1 + $0x7] ss:$16 sm:$0xc] %vm8_vm0, %v61_v23  }
  0x8a   :  { %145 = vst.msk [vmem:[%s333_s1 + $0x8] ss:$16 sm:$0x3] %vm8_vm0, %v69_v24   ;;  %146 = vst.msk [vmem:[%s333_s1 + $0x8] ss:$16 sm:$0xc] %vm8_vm0, %v69_v24  }
  0x8c   :  { %v77_v25 = vpop.permute.xlu0 %76  }
  0x8d   :  { %v85_v26 = vpop.permute.xlu1 %84   ;;  %147 = vst.msk [vmem:[%s333_s1 + $0x9] ss:$16 sm:$0x3] %vm8_vm0, %v77_v25   ;;  %148 = vst.msk [vmem:[%s333_s1 + $0x9] ss:$16 sm:$0xc] %vm8_vm0, %v77_v25  }
  0x8e   :  { %149 = vst.msk [vmem:[%s333_s1 + $0xa] ss:$16 sm:$0x3] %vm8_vm0, %v85_v26   ;;  %150 = vst.msk [vmem:[%s333_s1 + $0xa] ss:$16 sm:$0xc] %vm8_vm0, %v85_v26  }
  0x90   :  { %v93_v27 = vpop.permute.xlu0 %92  }
  0x91   :  { %v101_v28 = vpop.permute.xlu1 %100   ;;  %151 = vst.msk [vmem:[%s333_s1 + $0xb] ss:$16 sm:$0x3] %vm8_vm0, %v93_v27   ;;  %152 = vst.msk [vmem:[%s333_s1 + $0xb] ss:$16 sm:$0xc] %vm8_vm0, %v93_v27  }
  0x92   :  { %153 = vst.msk [vmem:[%s333_s1 + $0xc] ss:$16 sm:$0x3] %vm8_vm0, %v101_v28   ;;  %154 = vst.msk [vmem:[%s333_s1 + $0xc] ss:$16 sm:$0xc] %vm8_vm0, %v101_v28  }
  0x94   :  { %v109_v29 = vpop.permute.xlu0 %108  }
  0x95   :  { %v117_v30 = vpop.permute.xlu1 %116   ;;  %155 = vst.msk [vmem:[%s333_s1 + $0xd] ss:$16 sm:$0x3] %vm8_vm0, %v109_v29   ;;  %156 = vst.msk [vmem:[%s333_s1 + $0xd] ss:$16 sm:$0xc] %vm8_vm0, %v109_v29  }
  0x96   :  { %157 = vst.msk [vmem:[%s333_s1 + $0xe] ss:$16 sm:$0x3] %vm8_vm0, %v117_v30   ;;  %158 = vst.msk [vmem:[%s333_s1 + $0xe] ss:$16 sm:$0xc] %vm8_vm0, %v117_v30  }
  0x98   :  { %v125_v31 = vpop.permute.xlu0 %124  }
  0x99   :  { %159 = vst.msk [vmem:[%s333_s1 + $0xf] ss:$16 sm:$0x3] %vm8_vm0, %v125_v31   ;;  %160 = vst.msk [vmem:[%s333_s1 + $0xf] ss:$16 sm:$0xc] %vm8_vm0, %v125_v31  }

// kernel: yolox_wrapper_forward.2
= control target key start
LH: loop header
LB: loop body
LE: loop exit
PB: predicated region body
PF: predicated region fallthrough
CT: control target
= control target key end

     0   :  { %s3043_s21 = smov 0   ;;  %s3045_s22 = smov 0   ;;  %s3814_s0 = inlined_call_operand.vmem [shape: bf16[2,1,4,768], index: 0, kind: input, shape index: {}]   ;;  %s3815_s1 = inlined_call_operand.vmem [shape: bf16[768,512], index: 1, kind: input, shape index: {}]   ;;  %s3816_s2 = inlined_call_operand.vmem [shape: f32[1,512], index: 2, kind: input, shape index: {}]   ;;  %s3817_s3 = inlined_call_operand.vmem [shape: bf16[512,128], index: 3, kind: input, shape index: {}]   ;;  %s3818_s4 = inlined_call_operand.vmem [shape: f32[1,128], index: 4, kind: input, shape index: {}]   ;;  %s3819_s5 = inlined_call_operand.vmem [shape: f32[2,1,4,512], index: 5, kind: output, shape index: {0}]   ;;  %s3820_s6 = inlined_call_operand.vmem [shape: f32[2,1,4,128], index: 6, kind: output, shape index: {1}]  }
   0x1   :  { %s3047_s23 = smov 0  }
   0x2 LB: > { %s29_s24 = sadd.s32 1, %s3001_s22  ;;  %p2331_p0 = scmp.ge.s32.totalorder %s3005_s23, 1  ;;  %s3005_s23 = sphi %s3047_s23, %s17_s23   ;;  %s3001_s22 = sphi %s3045_s22, %s3822_s22   ;;  %s2997_s21 = sphi %s3043_s21, %s3821_s21  }
   0x3   : > { %p31_p1 = scmp.ge.s32.totalorder %s29_s24, 2  ;;  %p237_p2 = scmp.lt.s32.totalorder %s3005_s23, 3 }
   0x5   : > { %s3824_s24 = smov (%p31_p1, %s29_s24), 0  ;;  %p238_p3 = pnand %p2331_p0, %p237_p2 }
   0x6   : > { %p282_p4 = scmp.lt.s32.totalorder (!%p238_p3), %s2997_s21, 1 }
   0x7   : > { %241 = sbr.rel (%p238_p3) target bundleno = 676 (0x2a4), region = 40 }
   0xc   : > { %v2640_v0 = vld [vmem:[%s3815_s1 + $0xe4] ss:$16 sps:$4 sm:$0xff]   ;;  %v2644_v2 = vld [vmem:[%s3815_s1 + $0xe0] ss:$16 sps:$4 sm:$0xff]   ;;  %s3826_s21 = smov (!%p282_p4, %s2997_s21), 1  ;;  %v504_v36 = vlaneseq }
   0xd   : > { %v2642_v1 = vld [vmem:[%s3815_s1 + $0x2e4] ss:$16 sps:$4 sm:$0xff]   ;;  %1517 = vmatprep.subr.bf16.mxu0 %v2640_v0  ;;  %v2645_v3 = vld [vmem:[%s3815_s1 + $0x2e0] ss:$16 sps:$4 sm:$0xff]   ;;  %v3007_v37 = vmov 1983009808  }
   0xe   : > { %1558 = vmatprep.subr.bf16.mxu1 %v2642_v1  ;;  %v2646_v4 = vld [vmem:[%s3815_s1 + $0xc4] ss:$16 sps:$4 sm:$0xff]   ;;  %1518 = vmatpush1.bf16.msra.mxu0 %v2644_v2  ;;  %v2650_v6 = vld [vmem:[%s3815_s1 + $0xc0] ss:$16 sps:$4 sm:$0xff]   ;;  %v528_v38 = vunpack.c.l.s4 %v3007_v37  ;;  %s2614_s19 = smul.u32 12, %s3826_s21  ;;  %v3186_v42 = vshrl.u32 %v504_v36, 7 }
   0xf   : > { %1559 = vmatpush1.bf16.msra.mxu1 %v2645_v3  ;;  %v2648_v5 = vld [vmem:[%s3815_s1 + $0x2c4] ss:$16 sps:$4 sm:$0xff]   ;;  %1519 = vmatprep.subr.bf16.mxu0 %v2646_v4  ;;  %v2651_v7 = vld [vmem:[%s3815_s1 + $0x2c0] ss:$16 sps:$4 sm:$0xff]   ;;  %s2335_s29 = sshll.u32 %s3826_s21, 2 }
  0x10   : > { %1560 = vmatprep.subr.bf16.mxu1 %v2648_v5  ;;  %v2652_v8 = vld [vmem:[%s3815_s1 + $0xa4] ss:$16 sps:$4 sm:$0xff]   ;;  %v2656_v10 = vld [vmem:[%s3815_s1 + $0xa0] ss:$16 sps:$4 sm:$0xff]   ;;  %v529_v43 = vunpack.c.0.s8 %v528_v38  ;;  %s3206_s12 = scalar_lea.vmem %s3814_s0, %s2614_s19  ;;  %v2778_v38 = vld [vmem:[%s3815_s1 + $0x2c] ss:$16 sps:$4 sm:$0xff]   ;;  %s306_s8 = scalar_lea.vmem %s3820_s6, %s2335_s29 }
  0x11   : > { %v2654_v9 = vld [vmem:[%s3815_s1 + $0x2a4] ss:$16 sps:$4 sm:$0xff]   ;;  %v2657_v11 = vld [vmem:[%s3815_s1 + $0x2a0] ss:$16 sps:$4 sm:$0xff]   ;;  %s2569_s19 = sshll.u32 %s3826_s21, 4 }
  0x12   : > { %1520 = vmatpush1.bf16.msra.mxu0 %v2650_v6  ;;  %v2658_v12 = vld [vmem:[%s3815_s1 + $0x84] ss:$16 sps:$4 sm:$0xff]   ;;  %v2662_v14 = vld [vmem:[%s3815_s1 + $0x80] ss:$16 sps:$4 sm:$0xff]   ;;  %v532_v49 = vsub.s32 %v529_v43, %v3186_v42  ;;  %v2776_v43 = vld [vmem:[%s3815_s1 + $0x28] ss:$16 sps:$4 sm:$0xff]   ;;  %s3786_s26 = scalar_lea.vmem %s3819_s5, %s2569_s19 }
  0x13   : > { %1561 = vmatpush1.bf16.msra.mxu1 %v2651_v7  ;;  %1521 = vmatprep.subr.bf16.mxu0 %v2652_v8  ;;  %v2660_v13 = vld [vmem:[%s3815_s1 + $0x284] ss:$16 sps:$4 sm:$0xff]   ;;  %v2663_v15 = vld [vmem:[%s3815_s1 + $0x280] ss:$16 sps:$4 sm:$0xff]  }
  0x14   : > { %1562 = vmatprep.subr.bf16.mxu1 %v2654_v9  ;;  %v2664_v16 = vld [vmem:[%s3815_s1 + $0x64] ss:$16 sps:$4 sm:$0xff]   ;;  %v2668_v18 = vld [vmem:[%s3815_s1 + $0x60] ss:$16 sps:$4 sm:$0xff]  }
  0x15   : > { %v2666_v17 = vld [vmem:[%s3815_s1 + $0x264] ss:$16 sps:$4 sm:$0xff]   ;;  %v2669_v19 = vld [vmem:[%s3815_s1 + $0x260] ss:$16 sps:$4 sm:$0xff]  }
  0x16   : > { %1522 = vmatpush1.bf16.msra.mxu0 %v2656_v10  ;;  %v2670_v20 = vld [vmem:[%s3815_s1 + $0x44] ss:$16 sps:$4 sm:$0xff]   ;;  %v2674_v22 = vld [vmem:[%s3815_s1 + $0x40] ss:$16 sps:$4 sm:$0xff]  }
  0x17   : > { %1563 = vmatpush1.bf16.msra.mxu1 %v2657_v11  ;;  %1523 = vmatprep.subr.bf16.mxu0 %v2658_v12  ;;  %v2672_v21 = vld [vmem:[%s3815_s1 + $0x244] ss:$16 sps:$4 sm:$0xff]   ;;  %v2675_v23 = vld [vmem:[%s3815_s1 + $0x240] ss:$16 sps:$4 sm:$0xff]  }
  0x18   : > { %1564 = vmatprep.subr.bf16.mxu1 %v2660_v13  ;;  %v2676_v24 = vld [vmem:[%s3815_s1 + $0x24] ss:$16 sps:$4 sm:$0xff]   ;;  %v2680_v26 = vld [vmem:[%s3815_s1 + $0x20] ss:$16 sps:$4 sm:$0xff]   ;;  %v2742_v13 = vld [vmem:[%s3815_s1 + $0xec] ss:$16 sps:$4 sm:$0xff]  }
  0x19   : > { %v2678_v25 = vld [vmem:[%s3815_s1 + $0x224] ss:$16 sps:$4 sm:$0xff]   ;;  %v2681_v27 = vld [vmem:[%s3815_s1 + $0x220] ss:$16 sps:$4 sm:$0xff]  }
  0x1a   : > { %1524 = vmatpush1.bf16.msra.mxu0 %v2662_v14  ;;  %v2682_v28 = vld [vmem:[%s3815_s1 + $0x4] ss:$16 sps:$4 sm:$0xff]   ;;  %v2686_v30 = vld [vmem:[%s3815_s1] ss:$16 sps:$4 sm:$0xff]  }
  0x1b   : > { %1565 = vmatpush1.bf16.msra.mxu1 %v2663_v15  ;;  %1525 = vmatprep.subr.bf16.mxu0 %v2664_v16  ;;  %v2684_v29 = vld [vmem:[%s3815_s1 + $0x204] ss:$16 sps:$4 sm:$0xff]   ;;  %v2687_v31 = vld [vmem:[%s3815_s1 + $0x200] ss:$16 sps:$4 sm:$0xff]   ;;  %v2740_v15 = vld [vmem:[%s3815_s1 + $0xe8] ss:$16 sps:$4 sm:$0xff]  }
  0x1c   : > { %1566 = vmatprep.subr.bf16.mxu1 %v2666_v17  ;;  %v2688_v32 = vld [vmem:[%s3815_s1 + $0x1e4] ss:$16 sps:$4 sm:$0xff]   ;;  %v2692_v34 = vld [vmem:[%s3815_s1 + $0x1e0] ss:$16 sps:$4 sm:$0xff]   ;;  %v2748_v17 = vld [vmem:[%s3815_s1 + $0xcc] ss:$16 sps:$4 sm:$0xff]  }
  0x1d   : > { %v2690_v33 = vld [vmem:[%s3815_s1 + $0x3e4] ss:$16 sps:$4 sm:$0xff]   ;;  %v2693_v35 = vld [vmem:[%s3815_s1 + $0x3e0] ss:$16 sps:$4 sm:$0xff]  }
  0x1e   : > { %1526 = vmatpush1.bf16.msra.mxu0 %v2668_v18  ;;  %v2694_v39 = vld [vmem:[%s3815_s1 + $0x1c4] ss:$16 sps:$4 sm:$0xff]   ;;  %v2698_v41 = vld [vmem:[%s3815_s1 + $0x1c0] ss:$16 sps:$4 sm:$0xff]  }
  0x1f   : > { %1567 = vmatpush1.bf16.msra.mxu1 %v2669_v19  ;;  %1527 = vmatprep.subr.bf16.mxu0 %v2670_v20  ;;  %v2696_v40 = vld [vmem:[%s3815_s1 + $0x3c4] ss:$16 sps:$4 sm:$0xff]   ;;  %v2699_v44 = vld [vmem:[%s3815_s1 + $0x3c0] ss:$16 sps:$4 sm:$0xff]   ;;  %v2746_v19 = vld [vmem:[%s3815_s1 + $0xc8] ss:$16 sps:$4 sm:$0xff]  }
  0x20   : > { %1568 = vmatprep.subr.bf16.mxu1 %v2672_v21  ;;  %v2700_v45 = vld [vmem:[%s3815_s1 + $0x1a4] ss:$16 sps:$4 sm:$0xff]   ;;  %v2704_v47 = vld [vmem:[%s3815_s1 + $0x1a0] ss:$16 sps:$4 sm:$0xff]   ;;  %v2754_v21 = vld [vmem:[%s3815_s1 + $0xac] ss:$16 sps:$4 sm:$0xff]  }
  0x21   : > { %v2702_v46 = vld [vmem:[%s3815_s1 + $0x3a4] ss:$16 sps:$4 sm:$0xff]   ;;  %v2705_v48 = vld [vmem:[%s3815_s1 + $0x3a0] ss:$16 sps:$4 sm:$0xff]  }
  0x22   : > { %1528 = vmatpush1.bf16.msra.mxu0 %v2674_v22  ;;  %v2706_v50 = vld [vmem:[%s3815_s1 + $0x184] ss:$16 sps:$4 sm:$0xff]   ;;  %v2710_v53 = vld [vmem:[%s3815_s1 + $0x180] ss:$16 sps:$4 sm:$0xff]  }
  0x23   : > { %1569 = vmatpush1.bf16.msra.mxu1 %v2675_v23  ;;  %1529 = vmatprep.subr.bf16.mxu0 %v2676_v24  ;;  %v2708_v51 = vld [vmem:[%s3815_s1 + $0x384] ss:$16 sps:$4 sm:$0xff]   ;;  %v2711_v56 = vld [vmem:[%s3815_s1 + $0x380] ss:$16 sps:$4 sm:$0xff]   ;;  %v2752_v23 = vld [vmem:[%s3815_s1 + $0xa8] ss:$16 sps:$4 sm:$0xff]  }
  0x24   : > { %1570 = vmatprep.subr.bf16.mxu1 %v2678_v25  ;;  %v308_v52 = vld [vmem:[%s3206_s12] sm:$0xff]  ;;  %v2760_v25 = vld [vmem:[%s3815_s1 + $0x8c] ss:$16 sps:$4 sm:$0xff]  }
  0x25   : > { %v3219_v54 = vrot.slane %v308_v52, %v532_v49  ;;  %v526_v55 = vcombine.high %v308_v52, %v308_v52  ;;  %v2712_v57 = vld [vmem:[%s3815_s1 + $0x164] ss:$16 sps:$4 sm:$0xff]   ;;  %v2716_v61 = vld [vmem:[%s3815_s1 + $0x160] ss:$16 sps:$4 sm:$0xff]  }
  0x26   : > { %1530 = vmatpush1.bf16.msra.mxu0 %v2680_v26  ;;  %v2714_v58 = vld [vmem:[%s3815_s1 + $0x364] ss:$16 sps:$4 sm:$0xff]   ;;  %v2717_v63 = vld [vmem:[%s3815_s1 + $0x360] ss:$16 sps:$4 sm:$0xff]  }
  0x27   : > { %1571 = vmatpush1.bf16.msra.mxu1 %v2681_v27  ;;  %1531 = vmatprep.subr.bf16.mxu0 %v2682_v28  ;;  %v541_v59 = vcombine.high %v3219_v54, %v3219_v54  ;;  %v3232_v60 = vrot.slane %v526_v55, %v532_v49  ;;  %v2718_v0 = vld [vmem:[%s3815_s1 + $0x144] ss:$16 sps:$4 sm:$0xff]   ;;  %v2722_v2 = vld [vmem:[%s3815_s1 + $0x140] ss:$16 sps:$4 sm:$0xff]   ;;  %v2758_v27 = vld [vmem:[%s3815_s1 + $0x88] ss:$16 sps:$4 sm:$0xff]  }
  0x28   : > { %1572 = vmatprep.subr.bf16.mxu1 %v2684_v29  ;;  %v2720_v1 = vld [vmem:[%s3815_s1 + $0x344] ss:$16 sps:$4 sm:$0xff]   ;;  %v2723_v3 = vld [vmem:[%s3815_s1 + $0x340] ss:$16 sps:$4 sm:$0xff]   ;;  %v2766_v29 = vld [vmem:[%s3815_s1 + $0x6c] ss:$16 sps:$4 sm:$0xff]  }
  0x29   : > { %1549 = vmatprep.mubr.bf16.mxu0 %v541_v59  ;;  %v3239_v62 = vcombine.high %v3232_v60, %v3232_v60  ;;  %v2724_v4 = vld [vmem:[%s3815_s1 + $0x124] ss:$16 sps:$4 sm:$0xff]   ;;  %v2728_v6 = vld [vmem:[%s3815_s1 + $0x120] ss:$16 sps:$4 sm:$0xff]   ;;  %v2790_v49 = vld [vmem:[%s3815_s1 + $0x1ec] ss:$16 sps:$4 sm:$0xff]  }
  0x2a   : > { %1532 = vmatpush1.bf16.msra.mxu0 %v2686_v30  ;;  %v2726_v5 = vld [vmem:[%s3815_s1 + $0x324] ss:$16 sps:$4 sm:$0xff]   ;;  %v2729_v7 = vld [vmem:[%s3815_s1 + $0x320] ss:$16 sps:$4 sm:$0xff]  }
  0x2b   : > { %1573 = vmatpush1.bf16.msra.mxu1 %v2687_v31  ;;  %1533 = vmatprep.subr.bf16.mxu0 %v2688_v32  ;;  %v2730_v8 = vld [vmem:[%s3815_s1 + $0x104] ss:$16 sps:$4 sm:$0xff]   ;;  %v2734_v10 = vld [vmem:[%s3815_s1 + $0x100] ss:$16 sps:$4 sm:$0xff]   ;;  %v2764_v31 = vld [vmem:[%s3815_s1 + $0x68] ss:$16 sps:$4 sm:$0xff]  }
  0x2c   : > { %1574 = vmatprep.subr.bf16.mxu1 %v2690_v33  ;;  %1590 = vmatprep.mubr.bf16.mxu1 %v3239_v62  ;;  %v2732_v9 = vld [vmem:[%s3815_s1 + $0x304] ss:$16 sps:$4 sm:$0xff]   ;;  %v2735_v11 = vld [vmem:[%s3815_s1 + $0x300] ss:$16 sps:$4 sm:$0xff]   ;;  %v2772_v33 = vld [vmem:[%s3815_s1 + $0x4c] ss:$16 sps:$4 sm:$0xff]  }
  0x2d   : > { %v2739_v12 = vld [vmem:[%s3815_s1 + $0x4e4] ss:$16 sps:$4 sm:$0xff]   ;;  %v2737_v14 = vld [vmem:[%s3815_s1 + $0x4e0] ss:$16 sps:$4 sm:$0xff]  }
  0x2e   : > { %1534 = vmatpush2.bf16.msra.mxu0 %v2692_v34  ;;  %v2745_v16 = vld [vmem:[%s3815_s1 + $0x4c4] ss:$16 sps:$4 sm:$0xff]   ;;  %v2743_v18 = vld [vmem:[%s3815_s1 + $0x4c0] ss:$16 sps:$4 sm:$0xff]  }
  0x2f   : > { %1575 = vmatpush2.bf16.msra.mxu1 %v2693_v35  ;;  %1535 = vmatprep.subr.bf16.mxu0 %v2694_v39  ;;  %v2751_v20 = vld [vmem:[%s3815_s1 + $0x4a4] ss:$16 sps:$4 sm:$0xff]   ;;  %v2749_v22 = vld [vmem:[%s3815_s1 + $0x4a0] ss:$16 sps:$4 sm:$0xff]   ;;  %v2770_v35 = vld [vmem:[%s3815_s1 + $0x48] ss:$16 sps:$4 sm:$0xff]  }
  0x30   : > { %1576 = vmatprep.subr.bf16.mxu1 %v2696_v40  ;;  %v2757_v24 = vld [vmem:[%s3815_s1 + $0x484] ss:$16 sps:$4 sm:$0xff]   ;;  %v2755_v26 = vld [vmem:[%s3815_s1 + $0x480] ss:$16 sps:$4 sm:$0xff]  }
  0x31   : > { %v2763_v28 = vld [vmem:[%s3815_s1 + $0x464] ss:$16 sps:$4 sm:$0xff]   ;;  %v2761_v30 = vld [vmem:[%s3815_s1 + $0x460] ss:$16 sps:$4 sm:$0xff]  }
  0x32   : > { %1536 = vmatpush2.bf16.msra.mxu0 %v2698_v41  ;;  %v2769_v32 = vld [vmem:[%s3815_s1 + $0x444] ss:$16 sps:$4 sm:$0xff]   ;;  %v2767_v34 = vld [vmem:[%s3815_s1 + $0x440] ss:$16 sps:$4 sm:$0xff]  }
  0x33   : > { %1577 = vmatpush2.bf16.msra.mxu1 %v2699_v44  ;;  %1537 = vmatprep.subr.bf16.mxu0 %v2700_v45  ;;  %v2775_v37 = vld [vmem:[%s3815_s1 + $0x424] ss:$16 sps:$4 sm:$0xff]   ;;  %v3362_v39 = vld.sshfl [vmem:[%s3206_s12 + $0x8] sm:$0x33 pattern:$0x76325410] }
  0x34   : > { %1578 = vmatprep.subr.bf16.mxu1 %v2702_v46  ;;  %v3366_v40 = vcombine.high %v3362_v39, %v3362_v39  ;;  %v2773_v41 = vld [vmem:[%s3815_s1 + $0x420] ss:$16 sps:$4 sm:$0xff]   ;;  %v2781_v44 = vld [vmem:[%s3815_s1 + $0x404] ss:$16 sps:$4 sm:$0xff]   ;;  %v2784_v45 = vld [vmem:[%s3815_s1 + $0xc] ss:$16 sps:$4 sm:$0xff]  }
  0x35   : > { %v2779_v46 = vld [vmem:[%s3815_s1 + $0x400] ss:$16 sps:$4 sm:$0xff]   ;;  %v2793_v52 = vld [vmem:[%s3815_s1 + $0x5c4] ss:$16 sps:$4 sm:$0xff]  }
  0x36   : > { %1538 = vmatpush2.bf16.msra.mxu0 %v2704_v47  ;;  %v2782_v47 = vld [vmem:[%s3815_s1 + $0x8] ss:$16 sps:$4 sm:$0xff]   ;;  %v2791_v55 = vld [vmem:[%s3815_s1 + $0x5c0] ss:$16 sps:$4 sm:$0xff]  }
  0x37   : > { %1579 = vmatpush2.bf16.msra.mxu1 %v2705_v48  ;;  %1539 = vmatprep.subr.bf16.mxu0 %v2706_v50  ;;  %v2787_v48 = vld [vmem:[%s3815_s1 + $0x5e4] ss:$16 sps:$4 sm:$0xff]   ;;  %v2785_v50 = vld [vmem:[%s3815_s1 + $0x5e0] ss:$16 sps:$4 sm:$0xff]  }
  0x38   : > { %1580 = vmatprep.subr.bf16.mxu1 %v2708_v51  ;;  %v2788_v51 = vld [vmem:[%s3815_s1 + $0x1e8] ss:$16 sps:$4 sm:$0xff]  }
  0x3a   : > { %1540 = vmatpush2.bf16.msra.mxu0 %v2710_v53  ;;  %v2796_v53 = vld [vmem:[%s3815_s1 + $0x1cc] ss:$16 sps:$4 sm:$0xff]  }
  0x3b   : > { %1581 = vmatpush2.bf16.msra.mxu1 %v2711_v56  ;;  %1541 = vmatprep.subr.bf16.mxu0 %v2712_v57  ;;  %v2794_v56 = vld [vmem:[%s3815_s1 + $0x1c8] ss:$16 sps:$4 sm:$0xff]   ;;  %v2799_v57 = vld [vmem:[%s3815_s1 + $0x5a4] ss:$16 sps:$4 sm:$0xff]  }
  0x3c   : > { %1582 = vmatprep.subr.bf16.mxu1 %v2714_v58  ;;  %v2802_v58 = vld [vmem:[%s3815_s1 + $0x1ac] ss:$16 sps:$4 sm:$0xff]  }
  0x3e   : > { %1542 = vmatpush2.bf16.msra.mxu0 %v2716_v61  ;;  %v2800_v61 = vld [vmem:[%s3815_s1 + $0x1a8] ss:$16 sps:$4 sm:$0xff]  }
  0x3f   : > { %1583 = vmatpush2.bf16.msra.mxu1 %v2717_v63  ;;  %1543 = vmatprep.subr.bf16.mxu0 %v2718_v0  ;;  %v2805_v63 = vld [vmem:[%s3815_s1 + $0x584] ss:$16 sps:$4 sm:$0xff]   ;;  %v2808_v0 = vld [vmem:[%s3815_s1 + $0x18c] ss:$16 sps:$4 sm:$0xff]  }
  0x40   : > { %1584 = vmatprep.subr.bf16.mxu1 %v2720_v1  ;;  %v2803_v1 = vld [vmem:[%s3815_s1 + $0x580] ss:$16 sps:$4 sm:$0xff]  }
  0x42   : > { %1544 = vmatpush2.bf16.msra.mxu0 %v2722_v2  ;;  %v2806_v2 = vld [vmem:[%s3815_s1 + $0x188] ss:$16 sps:$4 sm:$0xff]  }
  0x43   : > { %1585 = vmatpush2.bf16.msra.mxu1 %v2723_v3  ;;  %1545 = vmatprep.subr.bf16.mxu0 %v2724_v4  ;;  %v2811_v3 = vld [vmem:[%s3815_s1 + $0x564] ss:$16 sps:$4 sm:$0xff]   ;;  %v2814_v4 = vld [vmem:[%s3815_s1 + $0x16c] ss:$16 sps:$4 sm:$0xff]  }
  0x44   : > { %1586 = vmatprep.subr.bf16.mxu1 %v2726_v5  ;;  %v2809_v5 = vld [vmem:[%s3815_s1 + $0x560] ss:$16 sps:$4 sm:$0xff]  }
  0x46   : > { %1546 = vmatpush2.bf16.msra.mxu0 %v2728_v6  ;;  %v2812_v6 = vld [vmem:[%s3815_s1 + $0x168] ss:$16 sps:$4 sm:$0xff]  }
  0x47   : > { %1587 = vmatpush2.bf16.msra.mxu1 %v2729_v7  ;;  %1547 = vmatprep.subr.bf16.mxu0 %v2730_v8  ;;  %v2817_v7 = vld [vmem:[%s3815_s1 + $0x544] ss:$16 sps:$4 sm:$0xff]   ;;  %v2820_v8 = vld [vmem:[%s3815_s1 + $0x14c] ss:$16 sps:$4 sm:$0xff]  }
  0x48   : > { %1588 = vmatprep.subr.bf16.mxu1 %v2732_v9  ;;  %v2815_v9 = vld [vmem:[%s3815_s1 + $0x540] ss:$16 sps:$4 sm:$0xff]  }
  0x4a   : > { %1548 = vmatpush2.bf16.msra.mxu0 %v2734_v10  ;;  %v2818_v10 = vld [vmem:[%s3815_s1 + $0x148] ss:$16 sps:$4 sm:$0xff]  }
  0x4b   : > { %1589 = vmatpush2.bf16.msra.mxu1 %v2735_v11  ;;  %1599 = vmatprep.subr.bf16.mxu0 %v2739_v12  ;;  %v2823_v11 = vld [vmem:[%s3815_s1 + $0x524] ss:$16 sps:$4 sm:$0xff]   ;;  %v2826_v12 = vld [vmem:[%s3815_s1 + $0x12c] ss:$16 sps:$4 sm:$0xff]  }
  0x4c   : > { %1640 = vmatprep.subr.bf16.mxu1 %v2742_v13  ;;  %v2821_v13 = vld [vmem:[%s3815_s1 + $0x520] ss:$16 sps:$4 sm:$0xff]  }
  0x4d   : > { %1550 = vmatmul.mubr.bf16.vlgmr.msra.gmra.mxu0 %v3219_v54 }
  0x4e   : > { %1591 = vmatmul.mubr.bf16.vlgmr.msra.gmra.mxu1 %v3232_v60  ;;  %1600 = vmatpush1.bf16.msra.mxu0 %v2737_v14  ;;  %v2824_v14 = vld [vmem:[%s3815_s1 + $0x128] ss:$16 sps:$4 sm:$0xff]  }
  0x4f   : > { %1641 = vmatpush1.bf16.msra.mxu1 %v2740_v15  ;;  %1601 = vmatprep.subr.bf16.mxu0 %v2745_v16  ;;  %v2829_v15 = vld [vmem:[%s3815_s1 + $0x504] ss:$16 sps:$4 sm:$0xff]   ;;  %v2832_v16 = vld [vmem:[%s3815_s1 + $0x10c] ss:$16 sps:$4 sm:$0xff]  }
  0x50   : > { %1642 = vmatprep.subr.bf16.mxu1 %v2748_v17  ;;  %1672 = vmatprep.mubr.bf16.mxu1 %v541_v59  ;;  %v2797_v59 = vld [vmem:[%s3815_s1 + $0x5a0] ss:$16 sps:$4 sm:$0xff]  }
  0x51   : > { %1631 = vmatprep.mubr.bf16.mxu0 %v3366_v40  ;;  %v2827_v17 = vld [vmem:[%s3815_s1 + $0x500] ss:$16 sps:$4 sm:$0xff]  }
  0x52   : > { %1602 = vmatpush1.bf16.msra.mxu0 %v2743_v18  ;;  %v2830_v18 = vld [vmem:[%s3815_s1 + $0x108] ss:$16 sps:$4 sm:$0xff]  }
  0x53   : > { %1643 = vmatpush1.bf16.msra.mxu1 %v2746_v19  ;;  %1603 = vmatprep.subr.bf16.mxu0 %v2751_v20  ;;  %v2835_v19 = vld [vmem:[%s3815_s1 + $0x2ec] ss:$16 sps:$4 sm:$0xff]  }
  0x54   : > { %1644 = vmatprep.subr.bf16.mxu1 %v2754_v21  ;;  %v2838_v20 = vld [vmem:[%s3815_s1 + $0x4ec] ss:$16 sps:$4 sm:$0xff]   ;;  %v2833_v21 = vld [vmem:[%s3815_s1 + $0x2e8] ss:$16 sps:$4 sm:$0xff]  }
  0x56   : > { %1604 = vmatpush1.bf16.msra.mxu0 %v2749_v22  ;;  %v2836_v22 = vld [vmem:[%s3815_s1 + $0x4e8] ss:$16 sps:$4 sm:$0xff]  }
  0x57   : > { %1645 = vmatpush1.bf16.msra.mxu1 %v2752_v23  ;;  %1605 = vmatprep.subr.bf16.mxu0 %v2757_v24  ;;  %v2841_v23 = vld [vmem:[%s3815_s1 + $0x2cc] ss:$16 sps:$4 sm:$0xff]  }
  0x58   : > { %1646 = vmatprep.subr.bf16.mxu1 %v2760_v25  ;;  %v2844_v24 = vld [vmem:[%s3815_s1 + $0x4cc] ss:$16 sps:$4 sm:$0xff]   ;;  %v2839_v25 = vld [vmem:[%s3815_s1 + $0x2c8] ss:$16 sps:$4 sm:$0xff]  }
  0x5a   : > { %1606 = vmatpush1.bf16.msra.mxu0 %v2755_v26  ;;  %v2842_v26 = vld [vmem:[%s3815_s1 + $0x4c8] ss:$16 sps:$4 sm:$0xff]  }
  0x5b   : > { %1647 = vmatpush1.bf16.msra.mxu1 %v2758_v27  ;;  %1607 = vmatprep.subr.bf16.mxu0 %v2763_v28  ;;  %v2847_v27 = vld [vmem:[%s3815_s1 + $0x2ac] ss:$16 sps:$4 sm:$0xff]  }
  0x5c   : > { %1648 = vmatprep.subr.bf16.mxu1 %v2766_v29  ;;  %v2850_v28 = vld [vmem:[%s3815_s1 + $0x4ac] ss:$16 sps:$4 sm:$0xff]   ;;  %v2845_v29 = vld [vmem:[%s3815_s1 + $0x2a8] ss:$16 sps:$4 sm:$0xff]  }
  0x5e   : > { %1608 = vmatpush1.bf16.msra.mxu0 %v2761_v30  ;;  %v2853_v30 = vld [vmem:[%s3815_s1 + $0x28c] ss:$16 sps:$4 sm:$0xff]  }
  0x5f   : > { %1649 = vmatpush1.bf16.msra.mxu1 %v2764_v31  ;;  %1609 = vmatprep.subr.bf16.mxu0 %v2769_v32  ;;  %v2856_v31 = vld [vmem:[%s3815_s1 + $0x48c] ss:$16 sps:$4 sm:$0xff]   ;;  %v2851_v32 = vld [vmem:[%s3815_s1 + $0x288] ss:$16 sps:$4 sm:$0xff]  }
  0x60   : > { %1650 = vmatprep.subr.bf16.mxu1 %v2772_v33  ;;  %v2859_v33 = vld [vmem:[%s3815_s1 + $0x26c] ss:$16 sps:$4 sm:$0xff]  }
  0x62   : > { %1610 = vmatpush1.bf16.msra.mxu0 %v2767_v34  ;;  %v2862_v34 = vld [vmem:[%s3815_s1 + $0x46c] ss:$16 sps:$4 sm:$0xff]  }
  0x63   : > { %1651 = vmatpush1.bf16.msra.mxu1 %v2770_v35  ;;  %1611 = vmatprep.subr.bf16.mxu0 %v2775_v37  ;;  %v2857_v35 = vld [vmem:[%s3815_s1 + $0x268] ss:$16 sps:$4 sm:$0xff]  }
  0x64   : > { %1652 = vmatprep.subr.bf16.mxu1 %v2778_v38  ;;  %v2860_v37 = vld [vmem:[%s3815_s1 + $0x468] ss:$16 sps:$4 sm:$0xff]   ;;  %v2865_v38 = vld [vmem:[%s3815_s1 + $0x24c] ss:$16 sps:$4 sm:$0xff]  }
  0x66   : > { %1612 = vmatpush1.bf16.msra.mxu0 %v2773_v41  ;;  %v2863_v41 = vld [vmem:[%s3815_s1 + $0x248] ss:$16 sps:$4 sm:$0xff]  }
  0x67   : > { %1653 = vmatpush1.bf16.msra.mxu1 %v2776_v43  ;;  %1613 = vmatprep.subr.bf16.mxu0 %v2781_v44  ;;  %v2866_v43 = vld [vmem:[%s3815_s1 + $0x448] ss:$16 sps:$4 sm:$0xff]   ;;  %v2871_v44 = vld [vmem:[%s3815_s1 + $0x22c] ss:$16 sps:$4 sm:$0xff]  }
  0x68   : > { %1654 = vmatprep.subr.bf16.mxu1 %v2784_v45  ;;  %v2874_v45 = vld [vmem:[%s3815_s1 + $0x42c] ss:$16 sps:$4 sm:$0xff]  }
  0x6a   : > { %1614 = vmatpush1.bf16.msra.mxu0 %v2779_v46  ;;  %v2869_v46 = vld [vmem:[%s3815_s1 + $0x228] ss:$16 sps:$4 sm:$0xff]  }
  0x6b   : > { %1655 = vmatpush1.bf16.msra.mxu1 %v2782_v47  ;;  %1615 = vmatprep.subr.bf16.mxu0 %v2787_v48  ;;  %v2872_v47 = vld [vmem:[%s3815_s1 + $0x428] ss:$16 sps:$4 sm:$0xff]   ;;  %v2877_v48 = vld [vmem:[%s3815_s1 + $0x20c] ss:$16 sps:$4 sm:$0xff]  }
  0x6c   : > { %1656 = vmatprep.subr.bf16.mxu1 %v2790_v49  ;;  %v2880_v49 = vld [vmem:[%s3815_s1 + $0x40c] ss:$16 sps:$4 sm:$0xff]  }
  0x6e   : > { %1616 = vmatpush2.bf16.msra.mxu0 %v2785_v50  ;;  %v2875_v50 = vld [vmem:[%s3815_s1 + $0x208] ss:$16 sps:$4 sm:$0xff]  }
  0x6f   : > { %1657 = vmatpush2.bf16.msra.mxu1 %v2788_v51  ;;  %1617 = vmatprep.subr.bf16.mxu0 %v2793_v52  ;;  %v2878_v51 = vld [vmem:[%s3815_s1 + $0x408] ss:$16 sps:$4 sm:$0xff]   ;;  %v2883_v52 = vld [vmem:[%s3815_s1 + $0x3ec] ss:$16 sps:$4 sm:$0xff]  }
  0x70   : > { %1658 = vmatprep.subr.bf16.mxu1 %v2796_v53  ;;  %v2886_v53 = vld [vmem:[%s3815_s1 + $0x5ec] ss:$16 sps:$4 sm:$0xff]  }
  0x72   : > { %1618 = vmatpush2.bf16.msra.mxu0 %v2791_v55  ;;  %v2881_v55 = vld [vmem:[%s3815_s1 + $0x3e8] ss:$16 sps:$4 sm:$0xff]  }
  0x73   : > { %1659 = vmatpush2.bf16.msra.mxu1 %v2794_v56  ;;  %1619 = vmatprep.subr.bf16.mxu0 %v2799_v57  ;;  %v2884_v56 = vld [vmem:[%s3815_s1 + $0x5e8] ss:$16 sps:$4 sm:$0xff]   ;;  %v2889_v57 = vld [vmem:[%s3815_s1 + $0x3cc] ss:$16 sps:$4 sm:$0xff]  }
  0x74   : > { %1660 = vmatprep.subr.bf16.mxu1 %v2802_v58  ;;  %v2892_v58 = vld [vmem:[%s3815_s1 + $0x5cc] ss:$16 sps:$4 sm:$0xff]  }
  0x76   : > { %1620 = vmatpush2.bf16.msra.mxu0 %v2797_v59  ;;  %v2887_v59 = vld [vmem:[%s3815_s1 + $0x3c8] ss:$16 sps:$4 sm:$0xff]  }
  0x77   : > { %1661 = vmatpush2.bf16.msra.mxu1 %v2800_v61  ;;  %1621 = vmatprep.subr.bf16.mxu0 %v2805_v63  ;;  %v2890_v61 = vld [vmem:[%s3815_s1 + $0x5c8] ss:$16 sps:$4 sm:$0xff]   ;;  %v2895_v63 = vld [vmem:[%s3815_s1 + $0x3ac] ss:$16 sps:$4 sm:$0xff]  }
  0x78   : > { %1662 = vmatprep.subr.bf16.mxu1 %v2808_v0  ;;  %v2898_v0 = vld [vmem:[%s3815_s1 + $0x5ac] ss:$16 sps:$4 sm:$0xff]  }
  0x7a   : > { %1622 = vmatpush2.bf16.msra.mxu0 %v2803_v1  ;;  %v2893_v1 = vld [vmem:[%s3815_s1 + $0x3a8] ss:$16 sps:$4 sm:$0xff]  }
  0x7b   : > { %1663 = vmatpush2.bf16.msra.mxu1 %v2806_v2  ;;  %1623 = vmatprep.subr.bf16.mxu0 %v2811_v3  ;;  %v2896_v2 = vld [vmem:[%s3815_s1 + $0x5a8] ss:$16 sps:$4 sm:$0xff]   ;;  %v2901_v3 = vld [vmem:[%s3815_s1 + $0x38c] ss:$16 sps:$4 sm:$0xff]  }
  0x7c   : > { %1664 = vmatprep.subr.bf16.mxu1 %v2814_v4  ;;  %v2904_v4 = vld [vmem:[%s3815_s1 + $0x58c] ss:$16 sps:$4 sm:$0xff]  }
  0x7e   : > { %1624 = vmatpush2.bf16.msra.mxu0 %v2809_v5  ;;  %v2899_v5 = vld [vmem:[%s3815_s1 + $0x388] ss:$16 sps:$4 sm:$0xff]  }
  0x7f   : > { %1665 = vmatpush2.bf16.msra.mxu1 %v2812_v6  ;;  %1625 = vmatprep.subr.bf16.mxu0 %v2817_v7  ;;  %v2902_v6 = vld [vmem:[%s3815_s1 + $0x588] ss:$16 sps:$4 sm:$0xff]   ;;  %v2907_v7 = vld [vmem:[%s3815_s1 + $0x36c] ss:$16 sps:$4 sm:$0xff]  }
  0x80   : > { %1666 = vmatprep.subr.bf16.mxu1 %v2820_v8  ;;  %v2910_v8 = vld [vmem:[%s3815_s1 + $0x56c] ss:$16 sps:$4 sm:$0xff]  }
  0x82   : > { %1626 = vmatpush2.bf16.msra.mxu0 %v2815_v9  ;;  %v2905_v9 = vld [vmem:[%s3815_s1 + $0x368] ss:$16 sps:$4 sm:$0xff]  }
  0x83   : > { %1667 = vmatpush2.bf16.msra.mxu1 %v2818_v10  ;;  %1627 = vmatprep.subr.bf16.mxu0 %v2823_v11  ;;  %v2908_v10 = vld [vmem:[%s3815_s1 + $0x568] ss:$16 sps:$4 sm:$0xff]   ;;  %v2913_v11 = vld [vmem:[%s3815_s1 + $0x34c] ss:$16 sps:$4 sm:$0xff]  }
  0x84   : > { %1668 = vmatprep.subr.bf16.mxu1 %v2826_v12  ;;  %v2916_v12 = vld [vmem:[%s3815_s1 + $0x54c] ss:$16 sps:$4 sm:$0xff]  }
  0x86   : > { %1628 = vmatpush2.bf16.msra.mxu0 %v2821_v13  ;;  %v2911_v13 = vld [vmem:[%s3815_s1 + $0x348] ss:$16 sps:$4 sm:$0xff]  }
  0x87   : > { %1669 = vmatpush2.bf16.msra.mxu1 %v2824_v14  ;;  %1629 = vmatprep.subr.bf16.mxu0 %v2829_v15  ;;  %v2914_v14 = vld [vmem:[%s3815_s1 + $0x548] ss:$16 sps:$4 sm:$0xff]   ;;  %v2919_v15 = vld [vmem:[%s3815_s1 + $0x32c] ss:$16 sps:$4 sm:$0xff]  }
  0x88   : > { %1670 = vmatprep.subr.bf16.mxu1 %v2832_v16  ;;  %v2922_v16 = vld [vmem:[%s3815_s1 + $0x52c] ss:$16 sps:$4 sm:$0xff]  }
  0x8a   : > { %1630 = vmatpush2.bf16.msra.mxu0 %v2827_v17  ;;  %v2917_v17 = vld [vmem:[%s3815_s1 + $0x328] ss:$16 sps:$4 sm:$0xff]  }
  0x8b   : > { %1671 = vmatpush2.bf16.msra.mxu1 %v2830_v18  ;;  %1681 = vmatprep.subr.bf16.mxu0 %v2835_v19  ;;  %v2920_v18 = vld [vmem:[%s3815_s1 + $0x528] ss:$16 sps:$4 sm:$0xff]   ;;  %v2925_v19 = vld [vmem:[%s3815_s1 + $0x30c] ss:$16 sps:$4 sm:$0xff]  }
  0x8c   : > { %1722 = vmatprep.subr.bf16.mxu1 %v2838_v20  ;;  %v2928_v20 = vld [vmem:[%s3815_s1 + $0x50c] ss:$16 sps:$4 sm:$0xff]  }
  0x8d   : > { %1632 = vmatmul.mubr.bf16.vlgmr.msra.gmra.mxu0 %v3362_v39 }
  0x8e   : > { %1673 = vmatmul.mubr.bf16.vlgmr.msra.gmra.mxu1 %v3219_v54  ;;  %1682 = vmatpush1.bf16.msra.mxu0 %v2833_v21  ;;  %v2848_v54 = vld [vmem:[%s3815_s1 + $0x4a8] ss:$16 sps:$4 sm:$0xff]  }
  0x8f   : > { %1723 = vmatpush1.bf16.msra.mxu1 %v2836_v22  ;;  %1683 = vmatprep.subr.bf16.mxu0 %v2841_v23  ;;  %v2923_v21 = vld [vmem:[%s3815_s1 + $0x308] ss:$16 sps:$4 sm:$0xff]  }
  0x90   : > { %1724 = vmatprep.subr.bf16.mxu1 %v2844_v24  ;;  %1713 = vmatprep.mubr.bf16.mxu0 %v3239_v62  ;;  %v2854_v62 = vld [vmem:[%s3815_s1 + $0x488] ss:$16 sps:$4 sm:$0xff]  }
  0x91   : > { %1754 = vmatprep.mubr.bf16.mxu1 %v3366_v40  ;;  %v2868_v40 = vld [vmem:[%s3815_s1 + $0x44c] ss:$16 sps:$4 sm:$0xff]   ;;  %v2926_v22 = vld [vmem:[%s3815_s1 + $0x508] ss:$16 sps:$4 sm:$0xff]  }
  0x92   : > { %1684 = vmatpush1.bf16.msra.mxu0 %v2839_v25  ;;  %v2929_v23 = vld [vmem:[%s3817_s3 + $0x78] sm:$0xff]   ;;  %v2931_v25 = vld [vmem:[%s3817_s3 + $0x70] sm:$0xff]  }
  0x93   : > { %1725 = vmatpush1.bf16.msra.mxu1 %v2842_v26  ;;  %1685 = vmatprep.subr.bf16.mxu0 %v2847_v27  ;;  %v2930_v24 = vld [vmem:[%s3817_s3 + $0x38] sm:$0xff]   ;;  %v2934_v26 = vld [vmem:[%s3817_s3 + $0x28] sm:$0xff]   ;;  %v2935_v27 = vld [vmem:[%s3817_s3 + $0x60] sm:$0xff]  }
  0x94   : > { %1726 = vmatprep.subr.bf16.mxu1 %v2850_v28  ;;  %v2936_v28 = vld [vmem:[%s3817_s3 + $0x20] sm:$0xff]  }
  0x96   : > { %1686 = vmatpush1.bf16.msra.mxu0 %v2845_v29  ;;  %v2937_v29 = vld [vmem:[%s3817_s3 + $0x58] sm:$0xff]  }
  0x97   : > { %1727 = vmatpush1.bf16.msra.mxu1 %v2848_v54  ;;  %1687 = vmatprep.subr.bf16.mxu0 %v2853_v30  ;;  %v2938_v54 = vld [vmem:[%s3817_s3 + $0x18] sm:$0xff]   ;;  %v2939_v30 = vld [vmem:[%s3817_s3 + $0x50] sm:$0xff]  }
  0x98   : > { %1728 = vmatprep.subr.bf16.mxu1 %v2856_v31  ;;  %v2940_v31 = vld [vmem:[%s3817_s3 + $0x10] sm:$0xff]  }
  0x9a   : > { %1688 = vmatpush1.bf16.msra.mxu0 %v2851_v32  ;;  %v2941_v32 = vld [vmem:[%s3817_s3 + $0x48] sm:$0xff]  }
  0x9b   : > { %1729 = vmatpush1.bf16.msra.mxu1 %v2854_v62  ;;  %1689 = vmatprep.subr.bf16.mxu0 %v2859_v33  ;;  %v2942_v62 = vld [vmem:[%s3817_s3 + $0x8] sm:$0xff]   ;;  %v2943_v33 = vld [vmem:[%s3817_s3 + $0x40] sm:$0xff]  }
  0x9c   : > { %1730 = vmatprep.subr.bf16.mxu1 %v2862_v34  ;;  %v2944_v34 = vld [vmem:[%s3817_s3] sm:$0xff]  }
  0x9e   : > { %1690 = vmatpush1.bf16.msra.mxu0 %v2857_v35 }
  0x9f   : > { %1731 = vmatpush1.bf16.msra.mxu1 %v2860_v37  ;;  %1691 = vmatprep.subr.bf16.mxu0 %v2865_v38 }
  0xa0   : > { %1732 = vmatprep.subr.bf16.mxu1 %v2868_v40 }
  0xa2   : > { %1692 = vmatpush1.bf16.msra.mxu0 %v2863_v41 }
  0xa3   : > { %1733 = vmatpush1.bf16.msra.mxu1 %v2866_v43  ;;  %1693 = vmatprep.subr.bf16.mxu0 %v2871_v44 }
  0xa4   : > { %1734 = vmatprep.subr.bf16.mxu1 %v2874_v45 }
  0xa6   : > { %1694 = vmatpush1.bf16.msra.mxu0 %v2869_v46  ;;  %v2945_v46 = vld [vmem:[%s3817_s3 + $0xf8] sm:$0xff]  }
  0xa7   : > { %1735 = vmatpush1.bf16.msra.mxu1 %v2872_v47  ;;  %1695 = vmatprep.subr.bf16.mxu0 %v2877_v48  ;;  %v2946_v47 = vld [vmem:[%s3817_s3 + $0xb8] sm:$0xff]   ;;  %v2947_v48 = vld [vmem:[%s3817_s3 + $0xf0] sm:$0xff]  }
  0xa8   : > { %1736 = vmatprep.subr.bf16.mxu1 %v2880_v49  ;;  %v2948_v49 = vld [vmem:[%s3817_s3 + $0xb0] sm:$0xff]  }
  0xaa   : > { %1696 = vmatpush1.bf16.msra.mxu0 %v2875_v50  ;;  %v2949_v50 = vld [vmem:[%s3817_s3 + $0xe8] sm:$0xff]  }
  0xab   : > { %1737 = vmatpush1.bf16.msra.mxu1 %v2878_v51  ;;  %1697 = vmatprep.subr.bf16.mxu0 %v2883_v52  ;;  %v2950_v51 = vld [vmem:[%s3817_s3 + $0xa8] sm:$0xff]   ;;  %v2951_v52 = vld [vmem:[%s3817_s3 + $0xe0] sm:$0xff]  }
  0xac   : > { %1738 = vmatprep.subr.bf16.mxu1 %v2886_v53  ;;  %v2952_v53 = vld [vmem:[%s3817_s3 + $0xa0] sm:$0xff]  }
  0xae   : > { %1698 = vmatpush2.bf16.msra.mxu0 %v2881_v55  ;;  %v2953_v55 = vld [vmem:[%s3817_s3 + $0xd8] sm:$0xff]  }
  0xaf   : > { %1739 = vmatpush2.bf16.msra.mxu1 %v2884_v56  ;;  %1699 = vmatprep.subr.bf16.mxu0 %v2889_v57  ;;  %v2954_v56 = vld [vmem:[%s3817_s3 + $0x98] sm:$0xff]   ;;  %v2955_v57 = vld [vmem:[%s3817_s3 + $0xd0] sm:$0xff]  }
  0xb0   : > { %1740 = vmatprep.subr.bf16.mxu1 %v2892_v58  ;;  %v2956_v58 = vld [vmem:[%s3817_s3 + $0x90] sm:$0xff]  }
  0xb2   : > { %1700 = vmatpush2.bf16.msra.mxu0 %v2887_v59  ;;  %v2957_v59 = vld [vmem:[%s3817_s3 + $0xc8] sm:$0xff]  }
  0xb3   : > { %1741 = vmatpush2.bf16.msra.mxu1 %v2890_v61  ;;  %1701 = vmatprep.subr.bf16.mxu0 %v2895_v63  ;;  %v2958_v61 = vld [vmem:[%s3817_s3 + $0x88] sm:$0xff]   ;;  %v2959_v63 = vld [vmem:[%s3817_s3 + $0xc0] sm:$0xff]  }
  0xb4   : > { %1742 = vmatprep.subr.bf16.mxu1 %v2898_v0  ;;  %v2960_v0 = vld [vmem:[%s3817_s3 + $0x80] sm:$0xff]  }
  0xb6   : > { %1702 = vmatpush2.bf16.msra.mxu0 %v2893_v1  ;;  %v506_v1 = vsub.s32 0, %v3186_v42 }
  0xb7   : > { %1743 = vmatpush2.bf16.msra.mxu1 %v2896_v2  ;;  %1703 = vmatprep.subr.bf16.mxu0 %v2901_v3  ;;  %v502_v2 = vld [vmem:[%s3816_s2] sm:$0xf]  ;;  %v510_v3 = vsub.s32 1, %v3186_v42 }
  0xb8   : > { %1744 = vmatprep.subr.bf16.mxu1 %v2904_v4  ;;  %v507_v4 = vrot.slane %v502_v2, %v506_v1 }
  0xba   : > { %1704 = vmatpush2.bf16.msra.mxu0 %v2899_v5  ;;  %v511_v5 = vrot.slane %v502_v2, %v510_v3 }
  0xbb   : > { %1745 = vmatpush2.bf16.msra.mxu1 %v2902_v6  ;;  %1705 = vmatprep.subr.bf16.mxu0 %v2907_v7 }
  0xbc   : > { %1746 = vmatprep.subr.bf16.mxu1 %v2910_v8 }
  0xbe   : > { %1706 = vmatpush2.bf16.msra.mxu0 %v2905_v9 }
  0xbf   : > { %1747 = vmatpush2.bf16.msra.mxu1 %v2908_v10  ;;  %1707 = vmatprep.subr.bf16.mxu0 %v2913_v11 }
  0xc0   : > { %1748 = vmatprep.subr.bf16.mxu1 %v2916_v12 }
  0xc2   : > { %1708 = vmatpush2.bf16.msra.mxu0 %v2911_v13 }
  0xc3   : > { %1749 = vmatpush2.bf16.msra.mxu1 %v2914_v14  ;;  %1709 = vmatprep.subr.bf16.mxu0 %v2919_v15 }
  0xc4   : > { %1750 = vmatprep.subr.bf16.mxu1 %v2922_v16 }
  0xc6   : > { %1710 = vmatpush2.bf16.msra.mxu0 %v2917_v17 }
  0xc7   : > { %1751 = vmatpush2.bf16.msra.mxu1 %v2920_v18  ;;  %1711 = vmatprep.subr.bf16.mxu0 %v2925_v19 }
  0xc8   : > { %1752 = vmatprep.subr.bf16.mxu1 %v2928_v20 }
  0xca   : > { %1712 = vmatpush2.bf16.msra.mxu0 %v2923_v21 }
  0xcb   : > { %1753 = vmatpush2.bf16.msra.mxu1 %v2926_v22  ;;  %2570 = vmatprep.subr.bf16.mxu0 %v2929_v23 }
  0xcc   : > { %2592 = vmatprep.subr.bf16.mxu1 %v2945_v46 }
  0xcd   : > { %1714 = vmatmul.mubr.bf16.vlgmr.msra.gmra.mxu0 %v3232_v60  ;;  %v2932_v60 = vld [vmem:[%s3817_s3 + $0x30] sm:$0xff]  }
  0xce   : > { %1755 = vmatmul.mubr.bf16.vlgmr.msra.gmra.mxu1 %v3362_v39  ;;  %2571 = vmatpush3.bf16.msra.mxu0 %v2930_v24  ;;  %v2933_v39 = vld [vmem:[%s3817_s3 + $0x68] sm:$0xff]  }
  0xcf   : > { %2572 = vmatprep.subr.bf16.mxu0 %v2931_v25  ;;  %2593 = vmatpush3.bf16.msra.mxu1 %v2946_v47 }
  0xd0   : > { %2594 = vmatprep.subr.bf16.mxu1 %v2947_v48 }
  0xd2   : > { %2573 = vmatpush3.bf16.msra.mxu0 %v2932_v60 }
  0xd3   : > { %2574 = vmatprep.subr.bf16.mxu0 %v2933_v39  ;;  %2595 = vmatpush3.bf16.msra.mxu1 %v2948_v49 }
  0xd4   : > { %2596 = vmatprep.subr.bf16.mxu1 %v2949_v50 }
  0xd6   : > { %2575 = vmatpush3.bf16.msra.mxu0 %v2934_v26 }
  0xd7   : > { %2576 = vmatprep.subr.bf16.mxu0 %v2935_v27  ;;  %2597 = vmatpush3.bf16.msra.mxu1 %v2950_v51 }
  0xd8   : > { %2598 = vmatprep.subr.bf16.mxu1 %v2951_v52 }
  0xda   : > { %2577 = vmatpush3.bf16.msra.mxu0 %v2936_v28 }
  0xdb   : > { %2578 = vmatprep.subr.bf16.mxu0 %v2937_v29  ;;  %2599 = vmatpush3.bf16.msra.mxu1 %v2952_v53 }
  0xdc   : > { %2600 = vmatprep.subr.bf16.mxu1 %v2953_v55 }
  0xde   : > { %2579 = vmatpush3.bf16.msra.mxu0 %v2938_v54 }
  0xdf   : > { %2580 = vmatprep.subr.bf16.mxu0 %v2939_v30  ;;  %2601 = vmatpush3.bf16.msra.mxu1 %v2954_v56  ;;  %v514_v30 = vsub.s32 2, %v3186_v42 }
  0xe0   : > { %2602 = vmatprep.subr.bf16.mxu1 %v2955_v57 }
  0xe2   : > { %2581 = vmatpush3.bf16.msra.mxu0 %v2940_v31  ;;  %v518_v31 = vsub.s32 3, %v3186_v42 }
  0xe3   : > { %2582 = vmatprep.subr.bf16.mxu0 %v2941_v32  ;;  %2603 = vmatpush3.bf16.msra.mxu1 %v2956_v58  ;;  %v515_v32 = vrot.slane %v502_v2, %v514_v30 }
  0xe4   : > { %2604 = vmatprep.subr.bf16.mxu1 %v2957_v59 }
  0xe6   : > { %2583 = vmatpush3.bf16.msra.mxu0 %v2942_v62  ;;  %v519_v62 = vrot.slane %v502_v2, %v518_v31 }
  0xe7   : > { %2584 = vmatprep.subr.bf16.mxu0 %v2943_v33  ;;  %2605 = vmatpush3.bf16.msra.mxu1 %v2958_v61 }
  0xe8   : > { %2606 = vmatprep.subr.bf16.mxu1 %v2959_v63 }
  0xea   : > { %2585 = vmatpush3.bf16.msra.mxu0 %v2944_v34 }
  0xeb   : > { %2607 = vmatpush3.bf16.msra.mxu1 %v2960_v0 }
 0x10d   : > { %v1551_v35 = vpop.f32.mrf.mxu0 }
 0x10e   : > { %v1592_v37 = vpop.f32.mrf.mxu1  ;;  %v1552_v6 = vadd.f32 %v1551_v35, %v507_v4 }
 0x10f   : > { %v1553_v38 = vpop.f32.mrf.mxu0 }
 0x110   : > { %v1594_v40 = vpop.f32.mrf.mxu1  ;;  %v1554_v7 = vadd.f32 %v1553_v38, %v511_v5  ;;  %v1593_v8 = vadd.f32 %v1592_v37, %v1552_v6 }
 0x111   : > { %v1555_v41 = vpop.f32.mrf.mxu0 }
 0x112   : > { %v1596_v43 = vpop.f32.mrf.mxu1  ;;  %v1595_v11 = vadd.f32 %v1594_v40, %v1554_v7  ;;  %v2151_v7 = vand.u32 127, %v504_v36 }
 0x113   : > { %v1556_v44 = vpop.f32.mrf.mxu0 }
 0x114   : > { %v1597_v45 = vpop.f32.mrf.mxu1 }
 0x14d   : > { %v1633_v9 = vpop.f32.mrf.mxu0 }
 0x14e   : > { %v1674_v10 = vpop.f32.mrf.mxu1  ;;  %v1634_v12 = vadd.f32 %v1633_v9, %v1593_v8  ;;  %v2533_v8 = vld [vmem:[%s3818_s4] ss:$0 sm:$0xff] }
 0x14f   : > { %v1635_v13 = vpop.f32.mrf.mxu0  ;;  %v1675_v33 = vadd.f32 %v1674_v10, %v515_v32  ;;  %v2153_v10 = vmul.u32 16, %v3186_v42 }
 0x150   : > { %v1676_v14 = vpop.f32.mrf.mxu1  ;;  %v2529_v15 = vmul.f32 -1.442695, %v1634_v12  ;;  %v1636_v16 = vadd.f32 %v1635_v13, %v1595_v11  ;;  %v2154_v11 = vshra.s32 %v2151_v7, 3 }
 0x151   : > { %v1637_v17 = vpop.f32.mrf.mxu0  ;;  %v1677_v37 = vadd.f32 %v1676_v14, %v519_v62 }
 0x152   : > { %v1678_v18 = vpop.f32.mrf.mxu1  ;;  %2961 = vpow2.f32 %v2529_v15  ;;  %v2530_v19 = vmul.f32 -1.442695, %v1636_v16  ;;  %v2155_v15 = vadd.s32 %v2154_v11, %v2153_v10 }
 0x153   : > { %v1638_v20 = vpop.f32.mrf.mxu0 }
 0x154   : > { %v1679_v21 = vpop.f32.mrf.mxu1  ;;  %2963 = vpow2.f32 %v2530_v19  ;;  %v2156_v20 = vcvt.s32.f32 %v2155_v15 }
 0x156   : > { %v2159_v21 = vmul.f32 0.125, %v2156_v20 }
 0x15f   : > { %v2962_v22 = vpop.eup %2961 }
 0x160   : > { %v1775_v23 = vadd.f32 1.0, %v2962_v22  ;;  %v2160_v22 = vfloor.f32 %v2159_v21 }
 0x161   : > { %v2964_v24 = vpop.eup %2963 }
 0x162   : > { %2965 = vrcp.f32 %v1775_v23  ;;  %v1776_v25 = vadd.f32 1.0, %v2964_v24  ;;  %v2161_v24 = vmul.f32 8.0, %v2160_v22 }
 0x164   : > { %2967 = vrcp.f32 %v1776_v25  ;;  %v2152_v25 = vand.u32 7, %v2151_v7 }
 0x166   : > { %vm2166_vm0 = vcmp.eq.s32.totalorder %v2152_v25, 0  ;;  %vm2167_vm1 = vcmp.eq.s32.totalorder %v2152_v25, 1  ;;  %vm2171_vm2 = vcmp.eq.s32.totalorder %v2152_v25, 4  ;;  %vm2172_vm3 = vcmp.eq.s32.totalorder %v2152_v25, 5 }
 0x167   : > { %vm2168_vm4 = vcmp.eq.s32.totalorder %v2152_v25, 2  ;;  %vm2169_vm5 = vcmp.eq.s32.totalorder %v2152_v25, 3  ;;  %vm2173_vm6 = vmor %vm2171_vm2, %vm2172_vm3 }
 0x168   : > { %vm2170_vm7 = vmor %vm2168_vm4, %vm2169_vm5 }
 0x169   : > { %vm2189_vm8 = vmor %vm2166_vm0, %vm2167_vm1 }
 0x16f   : > { %v2966_v60 = vpop.eup %2965 }
 0x170   : > { %v1787_v26 = vmul.f32 %v2966_v60, %v1634_v12 }
 0x171   : > { %v2968_v39 = vpop.eup %2967 }
 0x172   : > { %v1788_v27 = vmul.f32 %v2968_v39, %v1636_v16  ;;  %v1801_v54 = vpack.c.bf16 %v1787_v26, %v1787_v26  ;;  %v2162_v39 = vsub.f32 %v2156_v20, %v2161_v24 }
 0x174   : > { %v1795_v28 = vcombine.low %v1787_v26, %v1788_v27  ;;  %v1802_v29 = vpack.c.bf16 %v1788_v27, %v1788_v27  ;;  %v2174_v26 = vsel %vm2166_vm0, %v2162_v39, 0.0  ;;  %v2175_v27 = vsel %vm2167_vm1, %v2160_v22, 0.0 }
 0x176   : > { %1799 = vst [vmem:[%s3786_s26] sm:$0xff] %v1795_v28  ;;  %2100 = vmatprep.mubr.bf16.mxu0 %v1802_v29  ;;  %v2176_v28 = vadd.f32 %v2175_v27, %v2174_v26 }
 0x177   : > { %2101 = vmatmul.mubr.bf16.vlgmr.msra.gmra.mxu0 %v1801_v54 }
 0x18d   : > { %v1715_v34 = vpop.f32.mrf.mxu0 }
 0x18e   : > { %v1756_v35 = vpop.f32.mrf.mxu1  ;;  %v1716_v38 = vadd.f32 %v1715_v34, %v1675_v33 }
 0x18f   : > { %v1717_v40 = vpop.f32.mrf.mxu0 }
 0x190   : > { %v1758_v41 = vpop.f32.mrf.mxu1  ;;  %v1757_v43 = vadd.f32 %v1756_v35, %v1716_v38  ;;  %v1718_v44 = vadd.f32 %v1717_v40, %v1677_v37 }
 0x191   : > { %v1719_v45 = vpop.f32.mrf.mxu0 }
 0x192   : > { %v1760_v46 = vpop.f32.mrf.mxu1  ;;  %v2531_v47 = vmul.f32 -1.442695, %v1757_v43  ;;  %v1759_v48 = vadd.f32 %v1758_v41, %v1718_v44 }
 0x193   : > { %v1720_v49 = vpop.f32.mrf.mxu0 }
 0x194   : > { %v1761_v50 = vpop.f32.mrf.mxu1  ;;  %2969 = vpow2.f32 %v2531_v47  ;;  %v2532_v51 = vmul.f32 -1.442695, %v1759_v48 }
 0x196   : > { %2971 = vpow2.f32 %v2532_v51 }
 0x1a1   : > { %v2970_v52 = vpop.eup %2969 }
 0x1a2   : > { %v1777_v53 = vadd.f32 1.0, %v2970_v52 }
 0x1a3   : > { %v2972_v55 = vpop.eup %2971 }
 0x1a4   : > { %2973 = vrcp.f32 %v1777_v53  ;;  %v1778_v56 = vadd.f32 1.0, %v2972_v55 }
 0x1a6   : > { %2975 = vrcp.f32 %v1778_v56 }
 0x1b1   : > { %v2974_v57 = vpop.eup %2973 }
 0x1b2   : > { %v1789_v59 = vmul.f32 %v2974_v57, %v1757_v43 }
 0x1b3   : > { %v2976_v58 = vpop.eup %2975 }
 0x1b4   : > { %v1790_v61 = vmul.f32 %v2976_v58, %v1759_v48  ;;  %v1803_v1 = vpack.c.bf16 %v1789_v59, %v1789_v59 }
 0x1b6   : > { %v1796_v63 = vcombine.low %v1789_v59, %v1790_v61  ;;  %v1804_v0 = vpack.c.bf16 %v1790_v61, %v1790_v61 }
 0x1b8   : > { %1800 = vst [vmem:[%s3786_s26 + $0x8] sm:$0xff] %v1796_v63  ;;  %2140 = vmatprep.mubr.bf16.mxu1 %v1804_v0 }
 0x1b9   : > { %2141 = vmatmul.mubr.bf16.vlgmr.msra.gmra.mxu1 %v1803_v1 }
 0x237   : > { %v2586_v2 = vpop.f32.mrf.mxu0 }
 0x239   : > { %v2587_v3 = vpop.f32.mrf.mxu0 }
 0x23a   : > { %v2588_v4 = vadd.f32 %v2587_v3, %v2586_v2 }
 0x23b   : > { %v2589_v5 = vpop.f32.mrf.mxu0 }
 0x23c   : > { %v2103_v13 = vadd.f32 %v2588_v4, %v2533_v8 }
 0x23d   : > { %v2590_v6 = vpop.f32.mrf.mxu0 }
 0x279   : > { %v2608_v9 = vpop.f32.mrf.mxu1 }
 0x27b   : > { %v2609_v12 = vpop.f32.mrf.mxu1 }
 0x27c   : > { %v2610_v14 = vadd.f32 %v2609_v12, %v2608_v9 }
 0x27d   : > { %v2611_v16 = vpop.f32.mrf.mxu1 }
 0x27e   : > { %v2143_v17 = vadd.f32 %v2610_v14, %v2103_v13 }
 0x27f   : > { %v2612_v18 = vpop.f32.mrf.mxu1 }
 0x280   : > { %v2566_v19 = vmul.f32 -1.442695, %v2143_v17  ;;  %v2179_v36 = vmin.f32 %v2143_v17, 20.0  ;;  %v2177_v54 = vadd.f32 %v2176_v28, %v2143_v17 }
 0x282   : > { %2977 = vpow2.f32 %v2566_v19  ;;  %v2180_v23 = vmul.f32 1.442695, %v2179_v36  ;;  %v2178_v32 = vmul.f32 2.0, %v2177_v54 }
 0x284   : > { %2979 = vpow2.f32 %v2180_v23 }
 0x28f   : > { %v2978_v60 = vpop.eup %2977 }
 0x290   : > { %v2186_v42 = vadd.f32 1.0, %v2978_v60 }
 0x291   : > { %v2980_v29 = vpop.eup %2979 }
 0x292   : > { %2981 = vrcp.f32 %v2186_v42  ;;  %v2182_v31 = vmul.f32 2.0, %v2980_v29 }
 0x29f   : > { %v2982_v30 = vpop.eup %2981 }
 0x2a0   : > { %v2190_v62 = vsel %vm2173_vm6, %v2982_v30, 0.0 }
 0x2a1   : > { %v2191_v33 = vsel %vm2170_vm7, %v2182_v31, %v2190_v62 }
 0x2a2   : > { %v2192_v34 = vsel %vm2189_vm8, %v2178_v32, %v2191_v33 }
 0x2a3   : > { %2193 = vst [vmem:[%s306_s8] sm:$0xf] %v2192_v34 }
 0x2a4 PF: > { %s17_s23 = sadd.s32 1, %s3005_s23   ;;  %s3821_s21 = smov %s3001_s22 }
 0x2a5   : > { %p14_p5 = scmp.ge.s32.totalorder %s17_s23, 4   ;;  %s3822_s22 = smov %s3824_s24 }
 0x2a7   :  { %16 = sbr.rel (!%p14_p5) target bundleno = 2 (0x2), region = 82 }

// kernel: yolox_wrapper_forward.3
= control target key start
LH: loop header
LB: loop body
LE: loop exit
PB: predicated region body
PF: predicated region fallthrough
CT: control target
= control target key end

     0   :  { %v513_v2 = vmov 2   ;;  %v514_v3 = vmov 0   ;;  %s515_s13 = smov 2   ;;  %v140_v10 = vlaneseq  ;;  %v517_v34 = vmov 3   ;;  %s792_s29 = smov 0   ;;  %s812_s0 = inlined_call_operand.vmem [shape: f32[64,8], index: 0, kind: input, shape index: {}]   ;;  %s813_s1 = inlined_call_operand.vmem [shape: f32[8,64], index: 1, kind: input, shape index: {}]   ;;  %s814_s2 = inlined_call_operand.vmem [shape: f32[1,64], index: 2, kind: output, shape index: {}]  }
   0x1   :  { %v537_v0 = vld [vmem:[%s812_s0] sm:$0xff]  ;;  %v542_v1 = vld [vmem:[%s812_s0 + $0x10] sm:$0xff]  ;;  %480 = vset.pattern.permute.xlu1 %v513_v2  ;;  %482 = vset.pattern.permute.xlu0 %v514_v3  ;;  %v550_v4 = vld [vmem:[%s812_s0 + $0x8] sm:$0xff]  ;;  %v518_v43 = vmov 1   ;;  %vm419_vm0 = vcmask 520196   ;;  %vm408_vm1 = vcmask 523264  }
   0x2   :  { %28 = vrot.lane.b32.xlu0 %v537_v0, %s515_s13  ;;  %32 = vrot.lane.b32.xlu1 %v542_v1, %s515_s13  ;;  %v555_v5 = vld [vmem:[%s812_s0 + $0x18] sm:$0xff]  ;;  %v562_v6 = vld [vmem:[%s812_s0 + $0x20] sm:$0xff]  ;;  %v592_v11 = vand.u32 127, %v140_v10  ;;  %v620_v27 = vshrl.u32 %v140_v10, 7 }
   0x3   :  { %v567_v7 = vld [vmem:[%s812_s0 + $0x28] sm:$0xff]  ;;  %v574_v8 = vld [vmem:[%s812_s0 + $0x30] sm:$0xff]  ;;  %v579_v9 = vld [vmem:[%s812_s0 + $0x38] sm:$0xff]  ;;  %s516_s0 = smov 127  }
   0x4   :  { %v142_v29 = vsub.s32 2, %v620_v27  ;;  %v186_v30 = vsub.s32 0, %v620_v27  ;;  %v634_v31 = vld [vmem:[%s813_s1] sm:$0xff] }
   0x5   :  { %420 = vst.msk [vmem:[%s814_s2 - $0x4] sm:$0x10] %vm419_vm0, %v634_v31 }
   0x6   :  { %30 = vrot.lane.b32.xlu0 %v550_v4, %s515_s13  ;;  %34 = vrot.lane.b32.xlu1 %v555_v5, %s515_s13  ;;  %v639_v32 = vrot.slane %v634_v31, %v142_v29  ;;  %v642_v33 = vrot.slane %v634_v31, %v186_v30 }
   0xa   :  { %36 = vrot.lane.b32.xlu0 %v562_v6, %s515_s13  ;;  %38 = vrot.lane.b32.xlu1 %v567_v7, %s515_s13 }
   0xe   :  { %40 = vrot.lane.b32.xlu0 %v574_v8, %s515_s13  ;;  %42 = vrot.lane.b32.xlu1 %v579_v9, %s515_s13 }
  0x12   :  { %113 = vperm.xlu1 %480, %v550_v4   ;;  %157 = vperm.xlu0 %482, %v550_v4  }
  0x16   :  { %117 = vperm.xlu1 %480, %v542_v1   ;;  %169 = vperm.xlu0 %482, %v562_v6  }
  0x1a   :  { %125 = vperm.xlu1 %480, %v562_v6  }
  0x1e   :  { %133 = vperm.xlu1 %480, %v574_v8  }
  0x22   :  { %481 = vset.pattern.permute.xlu1 %v514_v3 }
  0x23   :  { %153 = vperm.xlu1 %481, %v537_v0  }
  0x27   :  { %161 = vperm.xlu1 %481, %v542_v1  }
  0x2b   :  { %165 = vperm.xlu1 %481, %v555_v5  }
  0x74   :  { %v29_v12 = vpop.permute.xlu0 %28  ;;  %v33_v13 = vpop.permute.xlu1 %32 }
  0x75   :  { %v595_v14 = vsub.f32 %v537_v0, %v29_v12  ;;  %v599_v15 = vsub.f32 %v542_v1, %v33_v13 }
  0x77   :  { %68 = vrot.lane.b32.xlu0 %v595_v14, %s516_s0 }
  0x78   :  { %v31_v16 = vpop.permute.xlu0 %30  ;;  %v35_v17 = vpop.permute.xlu1 %34 }
  0x79   :  { %v602_v18 = vsub.f32 %v550_v4, %v31_v16  ;;  %v607_v19 = vsub.f32 %v555_v5, %v35_v17 }
  0x7b   :  { %72 = vrot.lane.b32.xlu0 %v599_v15, %s516_s0  ;;  %70 = vrot.lane.b32.xlu1 %v602_v18, %s516_s0 }
  0x7c   :  { %v37_v20 = vpop.permute.xlu0 %36  ;;  %v39_v21 = vpop.permute.xlu1 %38 }
  0x7d   :  { %v610_v22 = vsub.f32 %v562_v6, %v37_v20  ;;  %v615_v23 = vsub.f32 %v567_v7, %v39_v21  ;;  %v101_v20 = vrot.slane %v634_v31, 6 }
  0x7f   :  { %74 = vrot.lane.b32.xlu1 %v607_v19, %s516_s0  ;;  %76 = vrot.lane.b32.xlu0 %v610_v22, %s516_s0 }
  0x80   :  { %v41_v24 = vpop.permute.xlu0 %40  ;;  %v43_v25 = vpop.permute.xlu1 %42 }
  0x81   :  { %v618_v26 = vsub.f32 %v574_v8, %v41_v24  ;;  %v625_v28 = vsub.f32 %v579_v9, %v43_v25  ;;  %v103_v25 = vsub.f32 %v634_v31, %v101_v20 }
  0x83   :  { %78 = vrot.lane.b32.xlu1 %v615_v23, %s516_s0  ;;  %80 = vrot.lane.b32.xlu0 %v618_v26, %s516_s0 }
  0x87   :  { %82 = vrot.lane.b32.xlu1 %v625_v28, %s516_s0  ;;  %177 = vperm.xlu0 %482, %v574_v8  }
  0x8b   :  { %173 = vperm.xlu1 %481, %v567_v7   ;;  %483 = vset.pattern.permute.xlu0 %v517_v34 }
  0x8c   :  { %213 = vperm.xlu0 %483, %v537_v0  }
  0x8d   :  { %v114_v35 = vpop.permute.xlu1 %113  ;;  %v158_v36 = vpop.permute.xlu0 %157 }
  0x8e   :  { %v145_v37 = vmin.f32 %v114_v35, %v639_v32  ;;  %v189_v38 = vmax.f32 %v158_v36, %v642_v33 }
  0x8f   :  { %181 = vperm.xlu1 %481, %v579_v9  }
  0x90   :  { %225 = vperm.xlu0 %483, %v555_v5   ;;  %v650_v39 = vsub.f32 %v145_v37, %v189_v38 }
  0x91   :  { %v118_v40 = vpop.permute.xlu1 %117  ;;  %v686_v49 = vpop.permute.xlu0 %169 }
  0x92   :  { %v146_v45 = vmin.f32 %v118_v40, %v639_v32 }
  0x93   :  { %484 = vset.pattern.permute.xlu1 %v517_v34  ;;  %v105_v34 = vrot.slane %v103_v25, 1 }
  0x94   :  { %217 = vperm.xlu1 %484, %v550_v4   ;;  %233 = vperm.xlu0 %483, %v567_v7  }
  0x95   :  { %v654_v41 = vpop.permute.xlu1 %125 }
  0x98   :  { %221 = vperm.xlu1 %484, %v542_v1   ;;  %241 = vperm.xlu0 %483, %v579_v9  }
  0x99   :  { %v658_v42 = vpop.permute.xlu1 %133 }
  0x9c   :  { %229 = vperm.xlu1 %484, %v562_v6   ;;  %486 = vset.pattern.permute.xlu0 %v518_v43 }
  0x9d   :  { %261 = vperm.xlu0 %486, %v550_v4  }
  0x9e   :  { %v662_v44 = vpop.permute.xlu1 %153 }
  0x9f   :  { %v188_v40 = vmax.f32 %v662_v44, %v642_v33 }
  0xa0   :  { %237 = vperm.xlu1 %484, %v574_v8  }
  0xa1   :  { %273 = vperm.xlu0 %486, %v562_v6  }
  0xa2   :  { %v162_v46 = vpop.permute.xlu1 %161 }
  0xa3   :  { %v190_v47 = vmax.f32 %v162_v46, %v642_v33  ;;  %v107_v46 = vmul.f32 %v105_v34, %v103_v25 }
  0xa4   :  { %485 = vset.pattern.permute.xlu1 %v518_v43 }
  0xa5   :  { %257 = vperm.xlu1 %485, %v537_v0   ;;  %281 = vperm.xlu0 %486, %v574_v8   ;;  %v674_v48 = vsub.f32 %v146_v45, %v190_v47 }
  0xa6   :  { %v688_v50 = vpop.permute.xlu1 %165 }
  0xa9   :  { %265 = vperm.xlu1 %485, %v542_v1   ;;  %487 = vset.pattern.permute.xlu0 %v513_v2 }
  0xaa   :  { %109 = vperm.xlu0 %487, %v537_v0  }
  0xad   :  { %269 = vperm.xlu1 %485, %v555_v5  }
  0xae   :  { %121 = vperm.xlu0 %487, %v555_v5  }
  0xb1   :  { %277 = vperm.xlu1 %485, %v567_v7  }
  0xb2   :  { %129 = vperm.xlu0 %487, %v567_v7  }
  0xb5   :  { %285 = vperm.xlu1 %485, %v579_v9  }
  0xb6   :  { %137 = vperm.xlu0 %487, %v579_v9  }
  0xb9   :  { %488 = vset.pattern.permute.xlu1 %v513_v2 }
  0xe9   :  { %v69_v51 = vpop.permute.xlu0 %68 }
  0xea   :  { %v92_v52 = vmul.f32 %v69_v51, %v595_v14  ;;  %v148_v51 = vmin.f32 %v654_v41, %v639_v32 }
  0xec   :  { %326 = vperm.xlu0 %487, %v92_v52   ;;  %v192_v52 = vmax.f32 %v686_v49, %v642_v33  ;;  %v205_v49 = vmax.f32 %v650_v39, 0.0 }
  0xed   :  { %v71_v53 = vpop.permute.xlu1 %70  ;;  %v73_v54 = vpop.permute.xlu0 %72 }
  0xee   :  { %v93_v55 = vmul.f32 %v71_v53, %v602_v18  ;;  %v94_v58 = vmul.f32 %v73_v54, %v599_v15 }
  0xf0   :  { %331 = vperm.xlu1 %488, %v93_v55  }
  0xf1   :  { %v75_v56 = vpop.permute.xlu1 %74  ;;  %v77_v57 = vpop.permute.xlu0 %76 }
  0xf2   :  { %v95_v59 = vmul.f32 %v75_v56, %v607_v19  ;;  %v96_v61 = vmul.f32 %v77_v57, %v610_v22  ;;  %v246_v22 = vsub.s32 3, %v620_v27 }
  0xf4   :  { %341 = vperm.xlu0 %487, %v95_v59   ;;  %336 = vperm.xlu1 %488, %v94_v58   ;;  %v738_v58 = vrot.slane %v107_v46, %v142_v29 }
  0xf5   :  { %v79_v60 = vpop.permute.xlu1 %78  ;;  %v81_v63 = vpop.permute.xlu0 %80 }
  0xf6   :  { %v97_v62 = vmul.f32 %v79_v60, %v615_v23  ;;  %v98_v1 = vmul.f32 %v81_v63, %v618_v26  ;;  %v290_v23 = vsub.s32 1, %v620_v27  ;;  %v717_v26 = vrot.slane %v634_v31, %v246_v22 }
  0xf7   :  { %v191_v27 = vmax.f32 %v688_v50, %v642_v33 }
  0xf8   :  { %351 = vperm.xlu0 %487, %v97_v62   ;;  %346 = vperm.xlu1 %488, %v96_v61   ;;  %v200_v62 = vsub.f32 %v148_v51, %v192_v52 }
  0xf9   :  { %v83_v0 = vpop.permute.xlu1 %82 }
  0xfa   :  { %v99_v2 = vmul.f32 %v83_v0, %v625_v28  ;;  %v720_v28 = vrot.slane %v634_v31, %v290_v23 }
  0xfc   :  { %361 = vperm.xlu0 %487, %v99_v2   ;;  %356 = vperm.xlu1 %488, %v98_v1   ;;  %v150_v1 = vmin.f32 %v658_v42, %v639_v32 }
 0x102   :  { %v698_v3 = vpop.permute.xlu0 %177 }
 0x106   :  { %v700_v5 = vpop.permute.xlu1 %173 }
 0x107   :  { %v214_v4 = vpop.permute.xlu0 %213  ;;  %v193_v50 = vmax.f32 %v700_v5, %v642_v33 }
 0x108   :  { %v248_v35 = vmin.f32 %v214_v4, %v717_v26  ;;  %v206_v4 = vmax.f32 %v674_v48, 0.0 }
 0x10a   :  { %v702_v7 = vpop.permute.xlu1 %181 }
 0x10b   :  { %v226_v6 = vpop.permute.xlu0 %225 }
 0x10c   :  { %v251_v44 = vmin.f32 %v226_v6, %v717_v26 }
 0x10f   :  { %v704_v8 = vpop.permute.xlu0 %233  ;;  %v218_v9 = vpop.permute.xlu1 %217 }
 0x110   :  { %v249_v43 = vmin.f32 %v218_v9, %v717_v26  ;;  %v253_v6 = vmin.f32 %v704_v8, %v717_v26 }
 0x113   :  { %v706_v10 = vpop.permute.xlu0 %241  ;;  %v222_v12 = vpop.permute.xlu1 %221 }
 0x114   :  { %v250_v54 = vmin.f32 %v222_v12, %v717_v26  ;;  %v255_v48 = vmin.f32 %v706_v10, %v717_v26 }
 0x117   :  { %v230_v14 = vpop.permute.xlu1 %229 }
 0x118   :  { %v262_v13 = vpop.permute.xlu0 %261  ;;  %v252_v63 = vmin.f32 %v230_v14, %v717_v26 }
 0x119   :  { %v293_v45 = vmax.f32 %v262_v13, %v720_v28 }
 0x11b   :  { %v708_v16 = vpop.permute.xlu1 %237  ;;  %v301_v55 = vsub.f32 %v249_v43, %v293_v45 }
 0x11c   :  { %v274_v15 = vpop.permute.xlu0 %273  ;;  %v254_v8 = vmin.f32 %v708_v16, %v717_v26  ;;  %v208_v26 = vmax.f32 %v200_v62, 0.0 }
 0x11d   :  { %v296_v0 = vmax.f32 %v274_v15, %v720_v28  ;;  %v309_v29 = vmax.f32 %v301_v55, 0.0 }
 0x11f   :  { %v766_v23 = vmul.f32 %v309_v29, %v205_v49 }
 0x120   :  { %v710_v17 = vpop.permute.xlu0 %281  ;;  %v258_v18 = vpop.permute.xlu1 %257 }
 0x121   :  { %v292_v36 = vmax.f32 %v258_v18, %v720_v28  ;;  %v298_v20 = vmax.f32 %v710_v17, %v720_v28  ;;  %v194_v17 = vmax.f32 %v698_v3, %v642_v33 }
 0x123   :  { %v300_v47 = vsub.f32 %v248_v35, %v292_v36  ;;  %v202_v55 = vsub.f32 %v150_v1, %v194_v17 }
 0x124   :  { %v266_v21 = vpop.permute.xlu1 %265 }
 0x125   :  { %v110_v19 = vpop.permute.xlu0 %109  ;;  %v294_v56 = vmax.f32 %v266_v21, %v720_v28  ;;  %v308_v59 = vmax.f32 %v300_v47, 0.0 }
 0x126   :  { %v144_v37 = vmin.f32 %v110_v19, %v639_v32  ;;  %v304_v19 = vsub.f32 %v252_v63, %v296_v0 }
 0x127   :  { %v302_v2 = vsub.f32 %v250_v54, %v294_v56 }
 0x128   :  { %v270_v30 = vpop.permute.xlu1 %269  ;;  %v196_v31 = vsub.f32 %v144_v37, %v188_v40  ;;  %v195_v37 = vmax.f32 %v702_v7, %v642_v33  ;;  %v306_v40 = vsub.f32 %v254_v8, %v298_v20 }
 0x129   :  { %v122_v24 = vpop.permute.xlu0 %121  ;;  %v295_v41 = vmax.f32 %v270_v30, %v720_v28  ;;  %v310_v21 = vmax.f32 %v302_v2, 0.0 }
 0x12a   :  { %v204_v60 = vmax.f32 %v196_v31, 0.0  ;;  %v147_v61 = vmin.f32 %v122_v24, %v639_v32 }
 0x12b   :  { %v303_v14 = vsub.f32 %v251_v44, %v295_v41  ;;  %v318_v43 = vmul.f32 %v310_v21, %v206_v4  ;;  %v314_v44 = vmax.f32 %v306_v40, 0.0 }
 0x12c   :  { %v278_v53 = vpop.permute.xlu1 %277  ;;  %v199_v15 = vsub.f32 %v147_v61, %v191_v27  ;;  %v754_v18 = vmul.f32 %v308_v59, %v204_v60  ;;  %v210_v27 = vmax.f32 %v202_v55, 0.0 }
 0x12d   :  { %v130_v38 = vpop.permute.xlu0 %129  ;;  %v297_v39 = vmax.f32 %v278_v53, %v720_v28  ;;  %v311_v10 = vmax.f32 %v303_v14, 0.0 }
 0x12e   :  { %v149_v9 = vmin.f32 %v130_v38, %v639_v32  ;;  %v207_v35 = vmax.f32 %v199_v15, 0.0  ;;  %v312_v38 = vmax.f32 %v304_v19, 0.0  ;;  %v322_v4 = vmul.f32 %v314_v44, %v210_v27 }
 0x12f   :  { %v305_v24 = vsub.f32 %v253_v6, %v297_v39 }
 0x130   :  { %v286_v12 = vpop.permute.xlu1 %285  ;;  %v201_v25 = vsub.f32 %v149_v9, %v193_v50  ;;  %v319_v54 = vmul.f32 %v311_v10, %v207_v35  ;;  %v320_v56 = vmul.f32 %v312_v38, %v208_v26 }
 0x131   :  { %v138_v57 = vpop.permute.xlu0 %137  ;;  %v299_v30 = vmax.f32 %v286_v12, %v720_v28 }
 0x132   :  { %v151_v5 = vmin.f32 %v138_v57, %v639_v32  ;;  %v313_v32 = vmax.f32 %v305_v24, 0.0  ;;  %v209_v45 = vmax.f32 %v201_v25, 0.0 }
 0x133   :  { %v307_v46 = vsub.f32 %v255_v48, %v299_v30 }
 0x134   :  { %v203_v47 = vsub.f32 %v151_v5, %v195_v37  ;;  %v321_v41 = vmul.f32 %v313_v32, %v209_v45 }
 0x135   :  { %v315_v57 = vmax.f32 %v307_v46, 0.0 }
 0x136   :  { %v211_v59 = vmax.f32 %v203_v47, 0.0 }
 0x138   :  { %v323_v6 = vmul.f32 %v315_v57, %v211_v59 }
 0x167   :  { %v327_v13 = vpop.permute.xlu0 %326 }
 0x168   :  { %v368_v42 = vadd.f32 %v738_v58, %v327_v13 }
 0x16a   :  { %v376_v22 = vsub.f32 %v368_v42, %v754_v18 }
 0x16b   :  { %v332_v34 = vpop.permute.xlu1 %331 }
 0x16c   :  { %v384_v36 = vadd.f32 1e-09, %v376_v22  ;;  %v369_v16 = vadd.f32 %v738_v58, %v332_v34 }
 0x16e   :  { %489 = vrcp.f32 %v384_v36  ;;  %v377_v28 = vsub.f32 %v369_v16, %v766_v23 }
 0x16f   :  { %v337_v31 = vpop.permute.xlu1 %336  ;;  %v342_v51 = vpop.permute.xlu0 %341 }
 0x170   :  { %v385_v52 = vadd.f32 1e-09, %v377_v28  ;;  %v370_v53 = vadd.f32 %v738_v58, %v337_v31  ;;  %v371_v3 = vadd.f32 %v738_v58, %v342_v51 }
 0x172   :  { %491 = vrcp.f32 %v385_v52  ;;  %v378_v33 = vsub.f32 %v370_v53, %v318_v43  ;;  %v379_v7 = vsub.f32 %v371_v3, %v319_v54 }
 0x173   :  { %v347_v60 = vpop.permute.xlu1 %346  ;;  %v352_v61 = vpop.permute.xlu0 %351 }
 0x174   :  { %v386_v49 = vadd.f32 1e-09, %v378_v33  ;;  %v387_v62 = vadd.f32 1e-09, %v379_v7  ;;  %v372_v63 = vadd.f32 %v738_v58, %v347_v60  ;;  %v373_v0 = vadd.f32 %v738_v58, %v352_v61 }
 0x176   :  { %493 = vrcp.f32 %v386_v49  ;;  %v380_v29 = vsub.f32 %v372_v63, %v320_v56  ;;  %v381_v1 = vsub.f32 %v373_v0, %v321_v41 }
 0x177   :  { %495 = vrcp.f32 %v387_v62  ;;  %v357_v2 = vpop.permute.xlu1 %356  ;;  %v362_v39 = vpop.permute.xlu0 %361 }
 0x178   :  { %v388_v9 = vadd.f32 1e-09, %v380_v29  ;;  %v389_v12 = vadd.f32 1e-09, %v381_v1  ;;  %v374_v13 = vadd.f32 %v738_v58, %v357_v2  ;;  %v375_v14 = vadd.f32 %v738_v58, %v362_v39 }
 0x17a   :  { %497 = vrcp.f32 %v388_v9  ;;  %v382_v15 = vsub.f32 %v374_v13, %v322_v4  ;;  %v383_v42 = vsub.f32 %v375_v14, %v323_v6 }
 0x17b   :  { %v490_v50 = vpop.eup %489  ;;  %499 = vrcp.f32 %v389_v12 }
 0x17c   :  { %v393_v48 = vmul.f32 %v490_v50, %v754_v18  ;;  %v390_v8 = vadd.f32 1e-09, %v382_v15  ;;  %v391_v19 = vadd.f32 1e-09, %v383_v42 }
 0x17e   :  { %409 = vst.msk [vmem:[#allocation2] sm:$0xff] %vm408_vm1, %v393_v48  ;;  %501 = vrcp.f32 %v390_v8 }
 0x17f   :  { %v492_v20 = vpop.eup %491  ;;  %503 = vrcp.f32 %v391_v19 }
 0x180   :  { %v395_v21 = vmul.f32 %v492_v20, %v766_v23 }
 0x182   :  { %410 = vst.msk [vmem:[#allocation2 + $0x8] sm:$0xff] %vm408_vm1, %v395_v21 }
 0x183   :  { %v494_v58 = vpop.eup %493 }
 0x184   :  { %v496_v22 = vpop.eup %495  ;;  %v397_v24 = vmul.f32 %v494_v58, %v318_v43 }
 0x185   :  { %v399_v25 = vmul.f32 %v496_v22, %v319_v54 }
 0x186   :  { %411 = vst.msk [vmem:[#allocation2 + $0x10] sm:$0xff] %vm408_vm1, %v397_v24 }
 0x187   :  { %v498_v30 = vpop.eup %497  ;;  %412 = vst.msk [vmem:[#allocation2 + $0x18] sm:$0xff] %vm408_vm1, %v399_v25 }
 0x188   :  { %v500_v18 = vpop.eup %499  ;;  %v401_v5 = vmul.f32 %v498_v30, %v320_v56 }
 0x189   :  { %v403_v34 = vmul.f32 %v500_v18, %v321_v41 }
 0x18a   :  { %413 = vst.msk [vmem:[#allocation2 + $0x20] sm:$0xff] %vm408_vm1, %v401_v5 }
 0x18b   :  { %v502_v10 = vpop.eup %501  ;;  %414 = vst.msk [vmem:[#allocation2 + $0x28] sm:$0xff] %vm408_vm1, %v403_v34 }
 0x18c   :  { %v504_v23 = vpop.eup %503  ;;  %v405_v35 = vmul.f32 %v502_v10, %v322_v4 }
 0x18d   :  { %v407_v36 = vmul.f32 %v504_v23, %v323_v6 }
 0x18e   :  { %415 = vst.msk [vmem:[#allocation2 + $0x30] sm:$0xff] %vm408_vm1, %v405_v35 }
 0x18f   :  { %416 = vst.msk [vmem:[#allocation2 + $0x38] sm:$0xff] %vm408_vm1, %v407_v36 }
 0x190 LB: > { %v427_v16 = vld [vmem:[%s814_s2] sm:$0x1]  ;;  %v428_v26 = vstv %s511_s29  ;;  %vm431_vm2 = vcmask 516096   ;;  %s442_s4 = scalar_lea.vmem [#allocation2], %s511_s29  ;;  %s426_s29 = sadd.s32 1, %s511_s29   ;;  %s511_s29 = sphi %s792_s29, %s426_s29  }
 0x191   : > { %vm429_vm3 = vcmp.eq.s32.totalorder %v592_v11, %v428_v26  ;;  %vm445_vm4 = vcmp.gt.s32.totalorder %v592_v11, %v428_v26  ;;  %p423_p1 = scmp.ge.s32.totalorder %s426_s29, 64  }
 0x192   : > { %v430_v17 = vsel %vm429_vm3, %v427_v16, 0.0 }
 0x193   : > { %v432_v37 = vsel %vm431_vm2, %v430_v17, -inf }
 0x194   : > { %433 = vmax.xlane.f32.xlu0 %v432_v37 }
 0x196   : > { %v443_v47 = vld [vmem:[%s442_s4] sm:$0x1] }
 0x197   : > { %vm444_vm5 = vcmp.gt.f32.partialorder %v443_v47, 0.5 }
 0x198   : > { %vm446_vm6 = vmand %vm444_vm5, %vm445_vm4 }
 0x21d   : > { %v434_v38 = vpop.xlane.xlu0 %433 }
 0x21e   : > { %v435_v40 = vrot.slane %v434_v38, 4 }
 0x220   : > { %v436_v28 = vmax.f32 %v434_v38, %v435_v40 }
 0x222   : > { %v437_v43 = vrot.slane %v436_v28, 2 }
 0x224   : > { %v438_v32 = vmax.f32 %v436_v28, %v437_v43 }
 0x226   : > { %v439_v45 = vrot.slane %v438_v32, 1 }
 0x228   : > { %v440_v46 = vmax.f32 %v438_v32, %v439_v45 }
 0x22a   : > { %464 = vpush %v440_v46 }
 0x25b   : > { %s465_s5 = spop %464 }
 0x25c   : > { %p447_p0 = scmp.gt.f32.partialorder %s465_s5, 0.0 }
 0x25e   : > { %s448_s6 = scalar_select %p447_p0, 1, 0 }
 0x260   : > { %v449_v31 = vstv %s448_s6  ;;  %425 = sbr.rel (!%p423_p1) target bundleno = 400 (0x190), region = 36 }
 0x261   : > { %vm450_vm7 = vcmp.eq.s32.totalorder %v449_v31, 1 }
 0x262   : > { %vm451_vm8 = vmand %vm450_vm7, %vm446_vm6 }
 0x263   : > { %v452_v51 = vsel %vm451_vm8, 0.0, %v427_v16 }
 0x264   : > { %453 = vst.msk [vmem:[%s814_s2] sm:$0x1] %vm431_vm2, %v452_v51 }

</bundles_post_ra>
